<compile_context>
chip_gen: v5e
topology: v5e:2x2
jax: 0.10.0
libtpu: 0.0.40
codegen_flags: <defaults>
</compile_context>

<pallas_src>
from functools import partial

import jax
import jax.numpy as jnp
from jax.experimental import pallas as pl
from jax.experimental.pallas import tpu as pltpu

V_THRESHOLD = 1.0
BN_EPS = 1e-5


def _shift_flat(v, d, hw_len):
    """s[:, i] = v[:, i + d] when 0 <= i + d < hw_len, else 0 (static shift d).

    Implemented with explicit zero blocks + static slices (no roll-direction
    ambiguity); the zero fill exactly covers the image top/bottom halo rows.
    """
    if d == 0:
        return v
    pad = jnp.zeros((v.shape[0], abs(d)), v.dtype)
    if d > 0:
        return jnp.concatenate([v[:, d:], pad], axis=1)
    return jnp.concatenate([pad, v[:, :hw_len + d]], axis=1)


def _shift_conv3x3(v_bf, w_ref, mask_l, mask_r, H, W):
    """3x3 stride-1 zero-padded conv, channels-major, register-accumulated.

    v_bf   : (cin, H*W) bf16 activation, row-major h*W+w on the lane axis
    w_ref  : VMEM ref (3, 3, cout, cin) bf16 (per-tap matrices)
    mask_l : (1, H*W) bool, column >= 1      (valid when reading the left neighbour)
    mask_r : (1, H*W) bool, column <= W - 2  (valid when reading the right neighbour)
    Returns (cout, H*W) float32; one MXU matmul per tap, 9 taps summed in vregs
    (no VMEM accumulator round trips).
    """
    HW = H * W
    acc = None
    for kh in range(3):
        dh = kh - 1
        for kw in range(3):
            dw = kw - 1
            tap = _shift_flat(v_bf, dh * W + dw, HW)
            # The flat shift lets neighbouring-row elements leak across the left/
            # right image edges; mask those columns out.
            if dw == -1:
                tap = jnp.where(mask_l, tap, jnp.zeros_like(tap))
            elif dw == 1:
                tap = jnp.where(mask_r, tap, jnp.zeros_like(tap))
            contrib = jnp.dot(w_ref[kh, kw], tap,
                              preferred_element_type=jnp.float32)  # (cout, HW) f32
            acc = contrib if acc is None else acc + contrib
    return acc


def basic_block_kernel(x_ref, col_ref, w1_ref, w2_ref, s1_ref, b1_ref, s2_ref,
                       b2_ref, x01_ref, x02_ref, x03_ref, x04_ref, x05_ref,
                       x06_ref, x07_ref, *, H, W, cin, cout):
    """Fused conv1->bn1->sn1 -> conv2->bn2->(+identity)->sn2 for one image."""
    HW = H * W

    # Per-channel BN affine constants (folded running stats), hoisted once per tile.
    s1 = s1_ref[...]          # (cout, 1) f32, broadcasts along the 256-lane axis
    b1 = b1_ref[...]
    s2 = s2_ref[...]
    b2 = b2_ref[...]

    # Column index per lane (precomputed in the wrapper; avoids in-kernel int div).
    col = col_ref[...]        # (1, HW) int32, value = lane % W
    mask_l = col >= 1
    mask_r = col <= W - 2

    x = x_ref[0]                              # (cin, HW) f32 -- conv1 input + identity
    x_bf = x.astype(jnp.bfloat16)             # single bf16 cast per stage (MXU operand)

    # ---- conv1 -> bn1 -> sn1 -------------------------------------------------
    x01 = _shift_conv3x3(x_bf, w1_ref, mask_l, mask_r, H, W)   # (cout, HW) f32
    x02 = x01 * s1 + b1                                        # folded BN (inference)
    x03 = (x02 >= V_THRESHOLD).astype(jnp.float32)             # single-step IF spike

    x01_ref[...] = x01.reshape(1, cout, HW)   # lane-dense (HW on lanes) unmasked store
    x02_ref[...] = x02.reshape(1, cout, HW)
    x03_ref[...] = x03.reshape(1, cout, HW)

    # ---- conv2 -> bn2 -> +identity -> sn2 -------------------------------------
    # x03 stays in vregs in the same channels-major layout -- no HBM round trip,
    # no halo scratch refill, no relayout between the two stages.
    x04 = _shift_conv3x3(x03.astype(jnp.bfloat16), w2_ref, mask_l, mask_r, H, W)
    x05 = x04 * s2 + b2
    x06 = x + x05                                              # downsample is None
    x07 = (x06 >= V_THRESHOLD).astype(jnp.float32)

    x04_ref[...] = x04.reshape(1, cout, HW)
    x05_ref[...] = x05.reshape(1, cout, HW)
    x06_ref[...] = x06.reshape(1, cout, HW)
    x07_ref[...] = x07.reshape(1, cout, HW)


def _fold_bn(bn, cout):
    scale = (bn["gamma"] / jnp.sqrt(bn["var"] + BN_EPS)).astype(jnp.float32)
    bias = (bn["beta"] - bn["mean"] * scale).astype(jnp.float32)
    return scale.reshape(cout, 1), bias.reshape(cout, 1)


def _compiler_params(batch):
    """Generation-aware CompilerParams (best-effort detection, safe fallbacks)."""
    vmem_cap = 64 * 1024 * 1024     # pessimistic default (v7x physical VMEM)
    n_cores = 1
    try:
        info = pltpu.get_tpu_info()
        vmem_cap = int(getattr(info, "vmem_capacity_bytes", vmem_cap))
        for attr in ("num_cores", "core_count", "tensorcore_count", "num_tensorcores"):
            if hasattr(info, attr):
                n_cores = int(getattr(info, attr))
                break
    except Exception:
        pass
    # ~48 MiB on v7x (64 MiB physical), ~96 MiB on v5e/v6e (128 MiB physical).
    vmem_limit = min(96 * 1024 * 1024, (3 * vmem_cap) // 4)
    # Only CORE_PARALLEL actually shards a grid axis across v7x's 2 TensorCores;
    # on single-core chips plain "parallel" keeps the pipelined double-buffered DMA.
    if n_cores > 1 and batch % n_cores == 0:
        sem = (pltpu.CORE_PARALLEL,)
    else:
        sem = ("parallel",)
    return pltpu.CompilerParams(dimension_semantics=sem,
                                vmem_limit_bytes=vmem_limit)


def basic_block_forward(x_nchw, w1_oihw, w2_oihw, bn1, bn2):
    """Fused SpikingResNet BasicBlock forward (stride=1, downsample=None).

    x_nchw  : (N, Cin, H, W) float32, PyTorch NCHW layout (only reshapes are applied)
    w*_oihw : (Cout, Cin, 3, 3) conv weights (PyTorch layout, bias=False)
    bn*     : dicts with per-channel "gamma"/"beta"/"mean"/"var" (inference mode)
    Returns [x01, x02, x03, x04, x05, x06, x07], each (N, Cout, H, W) float32.
    """
    N, cin, H, W = x_nchw.shape
    cout = w1_oihw.shape[0]
    if cin != cout:
        raise ValueError("downsample=None BasicBlock requires inplanes == planes "
                         f"(got {cin} vs {cout})")
    HW = H * W

    s1, b1 = _fold_bn(bn1, cout)
    s2, b2 = _fold_bn(bn2, cout)

    # Channels-major with the flattened spatial dim on lanes: (N, C, H*W).
    x = x_nchw.astype(jnp.float32).reshape(N, cin, HW)
    # Per-tap (cout, cin) weight matrices, MXU-native bf16.
    w1 = jnp.transpose(w1_oihw.astype(jnp.bfloat16), (2, 3, 0, 1))   # (3,3,cout,cin)
    w2 = jnp.transpose(w2_oihw.astype(jnp.bfloat16), (2, 3, 0, 1))
    # Column index per flat spatial position (built outside the kernel).
    col_ids = (jnp.arange(HW, dtype=jnp.int32) % W).reshape(1, HW)

    img_spec = pl.BlockSpec((1, cin, HW), lambda n: (n, 0, 0))
    col_spec = pl.BlockSpec((1, HW), lambda n: (0, 0))
    w1_spec = pl.BlockSpec((3, 3, cout, cin), lambda n: (0, 0, 0, 0))
    w2_spec = pl.BlockSpec((3, 3, cout, cout), lambda n: (0, 0, 0, 0))
    vec_spec = pl.BlockSpec((cout, 1), lambda n: (0, 0))
    out_spec = pl.BlockSpec((1, cout, HW), lambda n: (n, 0, 0))

    grid_spec = pltpu.PrefetchScalarGridSpec(
        num_scalar_prefetch=0,
        grid=(N,),                                   # one image per grid step
        in_specs=[img_spec, col_spec, w1_spec, w2_spec,
                  vec_spec, vec_spec, vec_spec, vec_spec],
        out_specs=tuple(out_spec for _ in range(7)),
    )

    feats = pl.pallas_call(
        partial(basic_block_kernel, H=H, W=W, cin=cin, cout=cout),
        grid_spec=grid_spec,
        out_shape=tuple(jax.ShapeDtypeStruct((N, cout, HW), jnp.float32)
                        for _ in range(7)),
        compiler_params=_compiler_params(N),
    )(x, col_ids, w1, w2, s1, b1, s2, b2)

    # TODO(synk): for real ResNet shapes additionally tile the grid over H rows
    # (1-row halo recompute), fold the 9 taps into the MXU contraction dim
    # (im2col, K=9*cin) on v6e/v7x, and optionally emit the non-spike maps as bf16
    # to cut the 7x HBM writeback.
    return [f.reshape(N, cout, H, W) for f in feats]


def reference_forward(x_nchw, w1_oihw, w2_oihw, bn1, bn2):
    """Pure-JAX NCHW reference mirroring the kernel's math (zero-padded 3x3 conv,
    bf16 MXU operands, float32 accumulation and element-wise)."""
    x = x_nchw.astype(jnp.float32)
    N, C, H, W = x.shape

    def conv3x3(inp, w_oihw):
        co = w_oihw.shape[0]
        xp = jnp.pad(inp, ((0, 0), (0, 0), (1, 1), (1, 1))).astype(jnp.bfloat16)
        wb = w_oihw.astype(jnp.bfloat16)
        acc = jnp.zeros((N, co, H, W), jnp.float32)
        for kh in range(3):
            for kw in range(3):
                patch = xp[:, :, kh:kh + H, kw:kw + W]
                acc = acc + jnp.einsum("oc,nchw->nohw", wb[:, :, kh, kw], patch,
                                       preferred_element_type=jnp.float32)
        return acc

    def bn(v, p):
        scale = (p["gamma"] / jnp.sqrt(p["var"] + BN_EPS)).astype(jnp.float32)
        bias = (p["beta"] - p["mean"] * scale).astype(jnp.float32)
        return v * scale.reshape(1, -1, 1, 1) + bias.reshape(1, -1, 1, 1)

    x01 = conv3x3(x, w1_oihw)
    x02 = bn(x01, bn1)
    x03 = (x02 >= V_THRESHOLD).astype(jnp.float32)
    x04 = conv3x3(x03, w2_oihw)
    x05 = bn(x04, bn2)
    x06 = x + x05
    x07 = (x06 >= V_THRESHOLD).astype(jnp.float32)
    return [x01, x02, x03, x04, x05, x06, x07]


if __name__ == "__main__":
    key = jax.random.PRNGKey(0)
    k_x, k_w1, k_w2 = jax.random.split(key, 3)

    N, C, H, W = 2, 4, 16, 16          # inplanes = planes = 4, stride = 1
    planes = C

    x = jax.random.normal(k_x, (N, C, H, W), dtype=jnp.float32)              # NCHW
    w1 = 0.2 * jax.random.normal(k_w1, (planes, C, 3, 3), dtype=jnp.float32)  # OIHW
    w2 = 0.2 * jax.random.normal(k_w2, (planes, planes, 3, 3), dtype=jnp.float32)

    bn1 = {"gamma": 1.0 + 0.1 * jnp.arange(planes, dtype=jnp.float32),
           "beta": 0.05 * jnp.arange(planes, dtype=jnp.float32),
           "mean": 0.01 * jnp.arange(planes, dtype=jnp.float32),
           "var": 1.0 + 0.02 * jnp.arange(planes, dtype=jnp.float32)}
    bn2 = {"gamma": 0.9 + 0.05 * jnp.arange(planes, dtype=jnp.float32),
           "beta": -0.03 * jnp.arange(planes, dtype=jnp.float32),
           "mean": -0.02 * jnp.arange(planes, dtype=jnp.float32),
           "var": 1.0 + 0.01 * jnp.arange(planes, dtype=jnp.float32)}

    feats = jax.jit(basic_block_forward)(x, w1, w2, bn1, bn2)
    feats = [jax.block_until_ready(f) for f in feats]

    ref = reference_forward(x, w1, w2, bn1, bn2)
    for i, (got, want) in enumerate(zip(feats, ref)):
        assert got.shape == want.shape and got.dtype == want.dtype, \
            (i, got.shape, want.shape, got.dtype, want.dtype)
        err = float(jnp.max(jnp.abs(got - want)))
        assert jnp.allclose(got, want, atol=1e-4, rtol=1e-4), (i, err)

    print("KERNEL_OK")
</pallas_src>

<mosaic_0001>
module attributes {stable_mosaic.version = 11 : i64} {
  func.func @basic_block_kernel(%arg0: i32, %arg1: memref<1x4x256xf32, #tpu.memory_space<vmem>>, %arg2: memref<1x256xi32, #tpu.memory_space<vmem>>, %arg3: memref<3x3x4x4xbf16, #tpu.memory_space<vmem>>, %arg4: memref<3x3x4x4xbf16, #tpu.memory_space<vmem>>, %arg5: memref<4x1xf32, #tpu.memory_space<vmem>>, %arg6: memref<4x1xf32, #tpu.memory_space<vmem>>, %arg7: memref<4x1xf32, #tpu.memory_space<vmem>>, %arg8: memref<4x1xf32, #tpu.memory_space<vmem>>, %arg9: memref<1x4x256xf32, #tpu.memory_space<vmem>>, %arg10: memref<1x4x256xf32, #tpu.memory_space<vmem>>, %arg11: memref<1x4x256xf32, #tpu.memory_space<vmem>>, %arg12: memref<1x4x256xf32, #tpu.memory_space<vmem>>, %arg13: memref<1x4x256xf32, #tpu.memory_space<vmem>>, %arg14: memref<1x4x256xf32, #tpu.memory_space<vmem>>, %arg15: memref<1x4x256xf32, #tpu.memory_space<vmem>>) attributes {dimension_semantics = [#tpu.dimension_semantics<parallel>], iteration_bounds = array<i64: 2>, scalar_prefetch = 0 : i64, scratch_operands = 0 : i64, tpu.core_type = #tpu.core_type<tc>, window_params = [{transform_indices = @transform_0, window_bounds = array<i64: 1, 4, 256>}, {pipeline_mode = #tpu.pipeline_mode<synchronous>, transform_indices = @transform_1, window_bounds = array<i64: 1, 256>}, {pipeline_mode = #tpu.pipeline_mode<synchronous>, transform_indices = @transform_2, window_bounds = array<i64: 3, 3, 4, 4>}, {pipeline_mode = #tpu.pipeline_mode<synchronous>, transform_indices = @transform_3, window_bounds = array<i64: 3, 3, 4, 4>}, {pipeline_mode = #tpu.pipeline_mode<synchronous>, transform_indices = @transform_4, window_bounds = array<i64: 4, 1>}, {pipeline_mode = #tpu.pipeline_mode<synchronous>, transform_indices = @transform_5, window_bounds = array<i64: 4, 1>}, {pipeline_mode = #tpu.pipeline_mode<synchronous>, transform_indices = @transform_6, window_bounds = array<i64: 4, 1>}, {pipeline_mode = #tpu.pipeline_mode<synchronous>, transform_indices = @transform_7, window_bounds = array<i64: 4, 1>}, {transform_indices = @transform_8, window_bounds = array<i64: 1, 4, 256>}, {transform_indices = @transform_9, window_bounds = array<i64: 1, 4, 256>}, {transform_indices = @transform_10, window_bounds = array<i64: 1, 4, 256>}, {transform_indices = @transform_11, window_bounds = array<i64: 1, 4, 256>}, {transform_indices = @transform_12, window_bounds = array<i64: 1, 4, 256>}, {transform_indices = @transform_13, window_bounds = array<i64: 1, 4, 256>}, {transform_indices = @transform_14, window_bounds = array<i64: 1, 4, 256>}]} {
    %c0 = arith.constant 0 : index
    %c0_0 = arith.constant 0 : index
    %0 = vector.load %arg5[%c0, %c0_0] : memref<4x1xf32, #tpu.memory_space<vmem>>, vector<4x1xf32>
    %c0_1 = arith.constant 0 : index
    %c0_2 = arith.constant 0 : index
    %1 = vector.load %arg6[%c0_1, %c0_2] : memref<4x1xf32, #tpu.memory_space<vmem>>, vector<4x1xf32>
    %c0_3 = arith.constant 0 : index
    %c0_4 = arith.constant 0 : index
    %2 = vector.load %arg7[%c0_3, %c0_4] : memref<4x1xf32, #tpu.memory_space<vmem>>, vector<4x1xf32>
    %c0_5 = arith.constant 0 : index
    %c0_6 = arith.constant 0 : index
    %3 = vector.load %arg8[%c0_5, %c0_6] : memref<4x1xf32, #tpu.memory_space<vmem>>, vector<4x1xf32>
    %c0_7 = arith.constant 0 : index
    %c0_8 = arith.constant 0 : index
    %4 = vector.load %arg2[%c0_7, %c0_8] : memref<1x256xi32, #tpu.memory_space<vmem>>, vector<1x256xi32>
    %c1_i32 = arith.constant 1 : i32
    %5 = vector.broadcast %c1_i32 : i32 to vector<1x256xi32>
    %6 = arith.cmpi sge, %4, %5 : vector<1x256xi32>
    %c14_i32 = arith.constant 14 : i32
    %7 = vector.broadcast %c14_i32 : i32 to vector<1x256xi32>
    %8 = arith.cmpi sle, %4, %7 : vector<1x256xi32>
    %c0_9 = arith.constant 0 : index
    %c0_10 = arith.constant 0 : index
    %c0_11 = arith.constant 0 : index
    %9 = vector.load %arg1[%c0_9, %c0_10, %c0_11] : memref<1x4x256xf32, #tpu.memory_space<vmem>>, vector<1x4x256xf32>
    %10 = vector.shape_cast %9 : vector<1x4x256xf32> to vector<4x256xf32>
    %11 = arith.truncf %10 : vector<4x256xf32> to vector<4x256xbf16>
    %cst = arith.constant 0.000000e+00 : bf16
    %12 = vector.broadcast %cst : bf16 to vector<4x17xbf16>
    %13 = vector.extract_strided_slice %11 {offsets = [0, 0], sizes = [4, 239], strides = [1, 1]} : vector<4x256xbf16> to vector<4x239xbf16>
    %14 = tpu.concatenate %12, %13 in 1 : vector<4x17xbf16>, vector<4x239xbf16> -> vector<4x256xbf16>
    %cst_12 = arith.constant 0.000000e+00 : bf16
    %15 = vector.broadcast %cst_12 : bf16 to vector<4x256xbf16>
    %16 = vector.shape_cast %6 : vector<1x256xi1> to vector<1x256xi1>
    %17 = vector.broadcast %16 : vector<1x256xi1> to vector<4x256xi1>
    %18 = arith.select %17, %14, %15 : vector<4x256xi1>, vector<4x256xbf16>
    %c0_13 = arith.constant 0 : index
    %c0_14 = arith.constant 0 : index
    %c0_15 = arith.constant 0 : index
    %c0_16 = arith.constant 0 : index
    %19 = vector.load %arg3[%c0_13, %c0_14, %c0_15, %c0_16] : memref<3x3x4x4xbf16, #tpu.memory_space<vmem>>, vector<1x1x4x4xbf16>
    %20 = vector.shape_cast %19 : vector<1x1x4x4xbf16> to vector<4x4xbf16>
    %cst_17 = arith.constant dense<0.000000e+00> : vector<4x256xf32>
    %21 = tpu.matmul %20, %18, %cst_17 {dimension_numbers = #tpu.dot_dimension_numbers<[1], [0], [0], [1], [0, 0, 1, 1], [], []>} : vector<4x4xbf16>, vector<4x256xbf16>, vector<4x256xf32> -> vector<4x256xf32>
    %cst_18 = arith.constant 0.000000e+00 : bf16
    %22 = vector.broadcast %cst_18 : bf16 to vector<4x16xbf16>
    %23 = vector.extract_strided_slice %11 {offsets = [0, 0], sizes = [4, 240], strides = [1, 1]} : vector<4x256xbf16> to vector<4x240xbf16>
    %24 = tpu.concatenate %22, %23 in 1 : vector<4x16xbf16>, vector<4x240xbf16> -> vector<4x256xbf16>
    %c0_19 = arith.constant 0 : index
    %c1 = arith.constant 1 : index
    %c0_20 = arith.constant 0 : index
    %c0_21 = arith.constant 0 : index
    %25 = vector.load %arg3[%c0_19, %c1, %c0_20, %c0_21] : memref<3x3x4x4xbf16, #tpu.memory_space<vmem>>, vector<1x1x4x4xbf16>
    %26 = vector.shape_cast %25 : vector<1x1x4x4xbf16> to vector<4x4xbf16>
    %cst_22 = arith.constant dense<0.000000e+00> : vector<4x256xf32>
    %27 = tpu.matmul %26, %24, %cst_22 {dimension_numbers = #tpu.dot_dimension_numbers<[1], [0], [0], [1], [0, 0, 1, 1], [], []>} : vector<4x4xbf16>, vector<4x256xbf16>, vector<4x256xf32> -> vector<4x256xf32>
    %28 = arith.addf %21, %27 : vector<4x256xf32>
    %cst_23 = arith.constant 0.000000e+00 : bf16
    %29 = vector.broadcast %cst_23 : bf16 to vector<4x15xbf16>
    %30 = vector.extract_strided_slice %11 {offsets = [0, 0], sizes = [4, 241], strides = [1, 1]} : vector<4x256xbf16> to vector<4x241xbf16>
    %31 = tpu.concatenate %29, %30 in 1 : vector<4x15xbf16>, vector<4x241xbf16> -> vector<4x256xbf16>
    %cst_24 = arith.constant 0.000000e+00 : bf16
    %32 = vector.broadcast %cst_24 : bf16 to vector<4x256xbf16>
    %33 = vector.shape_cast %8 : vector<1x256xi1> to vector<1x256xi1>
    %34 = vector.broadcast %33 : vector<1x256xi1> to vector<4x256xi1>
    %35 = arith.select %34, %31, %32 : vector<4x256xi1>, vector<4x256xbf16>
    %c0_25 = arith.constant 0 : index
    %c2 = arith.constant 2 : index
    %c0_26 = arith.constant 0 : index
    %c0_27 = arith.constant 0 : index
    %36 = vector.load %arg3[%c0_25, %c2, %c0_26, %c0_27] : memref<3x3x4x4xbf16, #tpu.memory_space<vmem>>, vector<1x1x4x4xbf16>
    %37 = vector.shape_cast %36 : vector<1x1x4x4xbf16> to vector<4x4xbf16>
    %cst_28 = arith.constant dense<0.000000e+00> : vector<4x256xf32>
    %38 = tpu.matmul %37, %35, %cst_28 {dimension_numbers = #tpu.dot_dimension_numbers<[1], [0], [0], [1], [0, 0, 1, 1], [], []>} : vector<4x4xbf16>, vector<4x256xbf16>, vector<4x256xf32> -> vector<4x256xf32>
    %39 = arith.addf %28, %38 : vector<4x256xf32>
    %cst_29 = arith.constant 0.000000e+00 : bf16
    %40 = vector.broadcast %cst_29 : bf16 to vector<4x1xbf16>
    %41 = vector.extract_strided_slice %11 {offsets = [0, 0], sizes = [4, 255], strides = [1, 1]} : vector<4x256xbf16> to vector<4x255xbf16>
    %42 = tpu.concatenate %40, %41 in 1 : vector<4x1xbf16>, vector<4x255xbf16> -> vector<4x256xbf16>
    %cst_30 = arith.constant 0.000000e+00 : bf16
    %43 = vector.broadcast %cst_30 : bf16 to vector<4x256xbf16>
    %44 = vector.shape_cast %6 : vector<1x256xi1> to vector<1x256xi1>
    %45 = vector.broadcast %44 : vector<1x256xi1> to vector<4x256xi1>
    %46 = arith.select %45, %42, %43 : vector<4x256xi1>, vector<4x256xbf16>
    %c1_31 = arith.constant 1 : index
    %c0_32 = arith.constant 0 : index
    %c0_33 = arith.constant 0 : index
    %c0_34 = arith.constant 0 : index
    %47 = vector.load %arg3[%c1_31, %c0_32, %c0_33, %c0_34] : memref<3x3x4x4xbf16, #tpu.memory_space<vmem>>, vector<1x1x4x4xbf16>
    %48 = vector.shape_cast %47 : vector<1x1x4x4xbf16> to vector<4x4xbf16>
    %cst_35 = arith.constant dense<0.000000e+00> : vector<4x256xf32>
    %49 = tpu.matmul %48, %46, %cst_35 {dimension_numbers = #tpu.dot_dimension_numbers<[1], [0], [0], [1], [0, 0, 1, 1], [], []>} : vector<4x4xbf16>, vector<4x256xbf16>, vector<4x256xf32> -> vector<4x256xf32>
    %50 = arith.addf %39, %49 : vector<4x256xf32>
    %c1_36 = arith.constant 1 : index
    %c1_37 = arith.constant 1 : index
    %c0_38 = arith.constant 0 : index
    %c0_39 = arith.constant 0 : index
    %51 = vector.load %arg3[%c1_36, %c1_37, %c0_38, %c0_39] : memref<3x3x4x4xbf16, #tpu.memory_space<vmem>>, vector<1x1x4x4xbf16>
    %52 = vector.shape_cast %51 : vector<1x1x4x4xbf16> to vector<4x4xbf16>
    %cst_40 = arith.constant dense<0.000000e+00> : vector<4x256xf32>
    %53 = tpu.matmul %52, %11, %cst_40 {dimension_numbers = #tpu.dot_dimension_numbers<[1], [0], [0], [1], [0, 0, 1, 1], [], []>} : vector<4x4xbf16>, vector<4x256xbf16>, vector<4x256xf32> -> vector<4x256xf32>
    %54 = arith.addf %50, %53 : vector<4x256xf32>
    %cst_41 = arith.constant 0.000000e+00 : bf16
    %55 = vector.broadcast %cst_41 : bf16 to vector<4x1xbf16>
    %56 = vector.extract_strided_slice %11 {offsets = [0, 1], sizes = [4, 255], strides = [1, 1]} : vector<4x256xbf16> to vector<4x255xbf16>
    %57 = tpu.concatenate %56, %55 in 1 : vector<4x255xbf16>, vector<4x1xbf16> -> vector<4x256xbf16>
    %cst_42 = arith.constant 0.000000e+00 : bf16
    %58 = vector.broadcast %cst_42 : bf16 to vector<4x256xbf16>
    %59 = vector.shape_cast %8 : vector<1x256xi1> to vector<1x256xi1>
    %60 = vector.broadcast %59 : vector<1x256xi1> to vector<4x256xi1>
    %61 = arith.select %60, %57, %58 : vector<4x256xi1>, vector<4x256xbf16>
    %c1_43 = arith.constant 1 : index
    %c2_44 = arith.constant 2 : index
    %c0_45 = arith.constant 0 : index
    %c0_46 = arith.constant 0 : index
    %62 = vector.load %arg3[%c1_43, %c2_44, %c0_45, %c0_46] : memref<3x3x4x4xbf16, #tpu.memory_space<vmem>>, vector<1x1x4x4xbf16>
    %63 = vector.shape_cast %62 : vector<1x1x4x4xbf16> to vector<4x4xbf16>
    %cst_47 = arith.constant dense<0.000000e+00> : vector<4x256xf32>
    %64 = tpu.matmul %63, %61, %cst_47 {dimension_numbers = #tpu.dot_dimension_numbers<[1], [0], [0], [1], [0, 0, 1, 1], [], []>} : vector<4x4xbf16>, vector<4x256xbf16>, vector<4x256xf32> -> vector<4x256xf32>
    %65 = arith.addf %54, %64 : vector<4x256xf32>
    %cst_48 = arith.constant 0.000000e+00 : bf16
    %66 = vector.broadcast %cst_48 : bf16 to vector<4x15xbf16>
    %67 = vector.extract_strided_slice %11 {offsets = [0, 15], sizes = [4, 241], strides = [1, 1]} : vector<4x256xbf16> to vector<4x241xbf16>
    %68 = tpu.concatenate %67, %66 in 1 : vector<4x241xbf16>, vector<4x15xbf16> -> vector<4x256xbf16>
    %cst_49 = arith.constant 0.000000e+00 : bf16
    %69 = vector.broadcast %cst_49 : bf16 to vector<4x256xbf16>
    %70 = vector.shape_cast %6 : vector<1x256xi1> to vector<1x256xi1>
    %71 = vector.broadcast %70 : vector<1x256xi1> to vector<4x256xi1>
    %72 = arith.select %71, %68, %69 : vector<4x256xi1>, vector<4x256xbf16>
    %c2_50 = arith.constant 2 : index
    %c0_51 = arith.constant 0 : index
    %c0_52 = arith.constant 0 : index
    %c0_53 = arith.constant 0 : index
    %73 = vector.load %arg3[%c2_50, %c0_51, %c0_52, %c0_53] : memref<3x3x4x4xbf16, #tpu.memory_space<vmem>>, vector<1x1x4x4xbf16>
    %74 = vector.shape_cast %73 : vector<1x1x4x4xbf16> to vector<4x4xbf16>
    %cst_54 = arith.constant dense<0.000000e+00> : vector<4x256xf32>
    %75 = tpu.matmul %74, %72, %cst_54 {dimension_numbers = #tpu.dot_dimension_numbers<[1], [0], [0], [1], [0, 0, 1, 1], [], []>} : vector<4x4xbf16>, vector<4x256xbf16>, vector<4x256xf32> -> vector<4x256xf32>
    %76 = arith.addf %65, %75 : vector<4x256xf32>
    %cst_55 = arith.constant 0.000000e+00 : bf16
    %77 = vector.broadcast %cst_55 : bf16 to vector<4x16xbf16>
    %78 = vector.extract_strided_slice %11 {offsets = [0, 16], sizes = [4, 240], strides = [1, 1]} : vector<4x256xbf16> to vector<4x240xbf16>
    %79 = tpu.concatenate %78, %77 in 1 : vector<4x240xbf16>, vector<4x16xbf16> -> vector<4x256xbf16>
    %c2_56 = arith.constant 2 : index
    %c1_57 = arith.constant 1 : index
    %c0_58 = arith.constant 0 : index
    %c0_59 = arith.constant 0 : index
    %80 = vector.load %arg3[%c2_56, %c1_57, %c0_58, %c0_59] : memref<3x3x4x4xbf16, #tpu.memory_space<vmem>>, vector<1x1x4x4xbf16>
    %81 = vector.shape_cast %80 : vector<1x1x4x4xbf16> to vector<4x4xbf16>
    %cst_60 = arith.constant dense<0.000000e+00> : vector<4x256xf32>
    %82 = tpu.matmul %81, %79, %cst_60 {dimension_numbers = #tpu.dot_dimension_numbers<[1], [0], [0], [1], [0, 0, 1, 1], [], []>} : vector<4x4xbf16>, vector<4x256xbf16>, vector<4x256xf32> -> vector<4x256xf32>
    %83 = arith.addf %76, %82 : vector<4x256xf32>
    %cst_61 = arith.constant 0.000000e+00 : bf16
    %84 = vector.broadcast %cst_61 : bf16 to vector<4x17xbf16>
    %85 = vector.extract_strided_slice %11 {offsets = [0, 17], sizes = [4, 239], strides = [1, 1]} : vector<4x256xbf16> to vector<4x239xbf16>
    %86 = tpu.concatenate %85, %84 in 1 : vector<4x239xbf16>, vector<4x17xbf16> -> vector<4x256xbf16>
    %cst_62 = arith.constant 0.000000e+00 : bf16
    %87 = vector.broadcast %cst_62 : bf16 to vector<4x256xbf16>
    %88 = vector.shape_cast %8 : vector<1x256xi1> to vector<1x256xi1>
    %89 = vector.broadcast %88 : vector<1x256xi1> to vector<4x256xi1>
    %90 = arith.select %89, %86, %87 : vector<4x256xi1>, vector<4x256xbf16>
    %c2_63 = arith.constant 2 : index
    %c2_64 = arith.constant 2 : index
    %c0_65 = arith.constant 0 : index
    %c0_66 = arith.constant 0 : index
    %91 = vector.load %arg3[%c2_63, %c2_64, %c0_65, %c0_66] : memref<3x3x4x4xbf16, #tpu.memory_space<vmem>>, vector<1x1x4x4xbf16>
    %92 = vector.shape_cast %91 : vector<1x1x4x4xbf16> to vector<4x4xbf16>
    %cst_67 = arith.constant dense<0.000000e+00> : vector<4x256xf32>
    %93 = tpu.matmul %92, %90, %cst_67 {dimension_numbers = #tpu.dot_dimension_numbers<[1], [0], [0], [1], [0, 0, 1, 1], [], []>} : vector<4x4xbf16>, vector<4x256xbf16>, vector<4x256xf32> -> vector<4x256xf32>
    %94 = arith.addf %83, %93 : vector<4x256xf32>
    %95 = vector.broadcast %0 : vector<4x1xf32> to vector<4x256xf32>
    %96 = arith.mulf %94, %95 : vector<4x256xf32>
    %97 = vector.broadcast %1 : vector<4x1xf32> to vector<4x256xf32>
    %98 = arith.addf %96, %97 : vector<4x256xf32>
    %cst_68 = arith.constant 1.000000e+00 : f32
    %99 = vector.broadcast %cst_68 : f32 to vector<4x256xf32>
    %100 = arith.cmpf oge, %98, %99 : vector<4x256xf32>
    %101 = arith.extui %100 : vector<4x256xi1> to vector<4x256xi32>
    %102 = arith.sitofp %101 : vector<4x256xi32> to vector<4x256xf32>
    %103 = vector.shape_cast %94 : vector<4x256xf32> to vector<1x4x256xf32>
    %c0_69 = arith.constant 0 : index
    %c0_70 = arith.constant 0 : index
    %c0_71 = arith.constant 0 : index
    %104 = vector.load %arg9[%c0_69, %c0_70, %c0_71] : memref<1x4x256xf32, #tpu.memory_space<vmem>>, vector<1x4x256xf32>
    tpu.vector_store %arg9[%c0_69, %c0_70, %c0_71], %103 {strides = array<i32>} : memref<1x4x256xf32, #tpu.memory_space<vmem>>, vector<1x4x256xf32>,
    %105 = vector.shape_cast %98 : vector<4x256xf32> to vector<1x4x256xf32>
    %c0_72 = arith.constant 0 : index
    %c0_73 = arith.constant 0 : index
    %c0_74 = arith.constant 0 : index
    %106 = vector.load %arg10[%c0_72, %c0_73, %c0_74] : memref<1x4x256xf32, #tpu.memory_space<vmem>>, vector<1x4x256xf32>
    tpu.vector_store %arg10[%c0_72, %c0_73, %c0_74], %105 {strides = array<i32>} : memref<1x4x256xf32, #tpu.memory_space<vmem>>, vector<1x4x256xf32>,
    %107 = vector.shape_cast %102 : vector<4x256xf32> to vector<1x4x256xf32>
    %c0_75 = arith.constant 0 : index
    %c0_76 = arith.constant 0 : index
    %c0_77 = arith.constant 0 : index
    %108 = vector.load %arg11[%c0_75, %c0_76, %c0_77] : memref<1x4x256xf32, #tpu.memory_space<vmem>>, vector<1x4x256xf32>
    tpu.vector_store %arg11[%c0_75, %c0_76, %c0_77], %107 {strides = array<i32>} : memref<1x4x256xf32, #tpu.memory_space<vmem>>, vector<1x4x256xf32>,
    %109 = arith.truncf %102 : vector<4x256xf32> to vector<4x256xbf16>
    %cst_78 = arith.constant 0.000000e+00 : bf16
    %110 = vector.broadcast %cst_78 : bf16 to vector<4x17xbf16>
    %111 = vector.extract_strided_slice %109 {offsets = [0, 0], sizes = [4, 239], strides = [1, 1]} : vector<4x256xbf16> to vector<4x239xbf16>
    %112 = tpu.concatenate %110, %111 in 1 : vector<4x17xbf16>, vector<4x239xbf16> -> vector<4x256xbf16>
    %cst_79 = arith.constant 0.000000e+00 : bf16
    %113 = vector.broadcast %cst_79 : bf16 to vector<4x256xbf16>
    %114 = vector.shape_cast %6 : vector<1x256xi1> to vector<1x256xi1>
    %115 = vector.broadcast %114 : vector<1x256xi1> to vector<4x256xi1>
    %116 = arith.select %115, %112, %113 : vector<4x256xi1>, vector<4x256xbf16>
    %c0_80 = arith.constant 0 : index
    %c0_81 = arith.constant 0 : index
    %c0_82 = arith.constant 0 : index
    %c0_83 = arith.constant 0 : index
    %117 = vector.load %arg4[%c0_80, %c0_81, %c0_82, %c0_83] : memref<3x3x4x4xbf16, #tpu.memory_space<vmem>>, vector<1x1x4x4xbf16>
    %118 = vector.shape_cast %117 : vector<1x1x4x4xbf16> to vector<4x4xbf16>
    %cst_84 = arith.constant dense<0.000000e+00> : vector<4x256xf32>
    %119 = tpu.matmul %118, %116, %cst_84 {dimension_numbers = #tpu.dot_dimension_numbers<[1], [0], [0], [1], [0, 0, 1, 1], [], []>} : vector<4x4xbf16>, vector<4x256xbf16>, vector<4x256xf32> -> vector<4x256xf32>
    %cst_85 = arith.constant 0.000000e+00 : bf16
    %120 = vector.broadcast %cst_85 : bf16 to vector<4x16xbf16>
    %121 = vector.extract_strided_slice %109 {offsets = [0, 0], sizes = [4, 240], strides = [1, 1]} : vector<4x256xbf16> to vector<4x240xbf16>
    %122 = tpu.concatenate %120, %121 in 1 : vector<4x16xbf16>, vector<4x240xbf16> -> vector<4x256xbf16>
    %c0_86 = arith.constant 0 : index
    %c1_87 = arith.constant 1 : index
    %c0_88 = arith.constant 0 : index
    %c0_89 = arith.constant 0 : index
    %123 = vector.load %arg4[%c0_86, %c1_87, %c0_88, %c0_89] : memref<3x3x4x4xbf16, #tpu.memory_space<vmem>>, vector<1x1x4x4xbf16>
    %124 = vector.shape_cast %123 : vector<1x1x4x4xbf16> to vector<4x4xbf16>
    %cst_90 = arith.constant dense<0.000000e+00> : vector<4x256xf32>
    %125 = tpu.matmul %124, %122, %cst_90 {dimension_numbers = #tpu.dot_dimension_numbers<[1], [0], [0], [1], [0, 0, 1, 1], [], []>} : vector<4x4xbf16>, vector<4x256xbf16>, vector<4x256xf32> -> vector<4x256xf32>
    %126 = arith.addf %119, %125 : vector<4x256xf32>
    %cst_91 = arith.constant 0.000000e+00 : bf16
    %127 = vector.broadcast %cst_91 : bf16 to vector<4x15xbf16>
    %128 = vector.extract_strided_slice %109 {offsets = [0, 0], sizes = [4, 241], strides = [1, 1]} : vector<4x256xbf16> to vector<4x241xbf16>
    %129 = tpu.concatenate %127, %128 in 1 : vector<4x15xbf16>, vector<4x241xbf16> -> vector<4x256xbf16>
    %cst_92 = arith.constant 0.000000e+00 : bf16
    %130 = vector.broadcast %cst_92 : bf16 to vector<4x256xbf16>
    %131 = vector.shape_cast %8 : vector<1x256xi1> to vector<1x256xi1>
    %132 = vector.broadcast %131 : vector<1x256xi1> to vector<4x256xi1>
    %133 = arith.select %132, %129, %130 : vector<4x256xi1>, vector<4x256xbf16>
    %c0_93 = arith.constant 0 : index
    %c2_94 = arith.constant 2 : index
    %c0_95 = arith.constant 0 : index
    %c0_96 = arith.constant 0 : index
    %134 = vector.load %arg4[%c0_93, %c2_94, %c0_95, %c0_96] : memref<3x3x4x4xbf16, #tpu.memory_space<vmem>>, vector<1x1x4x4xbf16>
    %135 = vector.shape_cast %134 : vector<1x1x4x4xbf16> to vector<4x4xbf16>
    %cst_97 = arith.constant dense<0.000000e+00> : vector<4x256xf32>
    %136 = tpu.matmul %135, %133, %cst_97 {dimension_numbers = #tpu.dot_dimension_numbers<[1], [0], [0], [1], [0, 0, 1, 1], [], []>} : vector<4x4xbf16>, vector<4x256xbf16>, vector<4x256xf32> -> vector<4x256xf32>
    %137 = arith.addf %126, %136 : vector<4x256xf32>
    %cst_98 = arith.constant 0.000000e+00 : bf16
    %138 = vector.broadcast %cst_98 : bf16 to vector<4x1xbf16>
    %139 = vector.extract_strided_slice %109 {offsets = [0, 0], sizes = [4, 255], strides = [1, 1]} : vector<4x256xbf16> to vector<4x255xbf16>
    %140 = tpu.concatenate %138, %139 in 1 : vector<4x1xbf16>, vector<4x255xbf16> -> vector<4x256xbf16>
    %cst_99 = arith.constant 0.000000e+00 : bf16
    %141 = vector.broadcast %cst_99 : bf16 to vector<4x256xbf16>
    %142 = vector.shape_cast %6 : vector<1x256xi1> to vector<1x256xi1>
    %143 = vector.broadcast %142 : vector<1x256xi1> to vector<4x256xi1>
    %144 = arith.select %143, %140, %141 : vector<4x256xi1>, vector<4x256xbf16>
    %c1_100 = arith.constant 1 : index
    %c0_101 = arith.constant 0 : index
    %c0_102 = arith.constant 0 : index
    %c0_103 = arith.constant 0 : index
    %145 = vector.load %arg4[%c1_100, %c0_101, %c0_102, %c0_103] : memref<3x3x4x4xbf16, #tpu.memory_space<vmem>>, vector<1x1x4x4xbf16>
    %146 = vector.shape_cast %145 : vector<1x1x4x4xbf16> to vector<4x4xbf16>
    %cst_104 = arith.constant dense<0.000000e+00> : vector<4x256xf32>
    %147 = tpu.matmul %146, %144, %cst_104 {dimension_numbers = #tpu.dot_dimension_numbers<[1], [0], [0], [1], [0, 0, 1, 1], [], []>} : vector<4x4xbf16>, vector<4x256xbf16>, vector<4x256xf32> -> vector<4x256xf32>
    %148 = arith.addf %137, %147 : vector<4x256xf32>
    %c1_105 = arith.constant 1 : index
    %c1_106 = arith.constant 1 : index
    %c0_107 = arith.constant 0 : index
    %c0_108 = arith.constant 0 : index
    %149 = vector.load %arg4[%c1_105, %c1_106, %c0_107, %c0_108] : memref<3x3x4x4xbf16, #tpu.memory_space<vmem>>, vector<1x1x4x4xbf16>
    %150 = vector.shape_cast %149 : vector<1x1x4x4xbf16> to vector<4x4xbf16>
    %cst_109 = arith.constant dense<0.000000e+00> : vector<4x256xf32>
    %151 = tpu.matmul %150, %109, %cst_109 {dimension_numbers = #tpu.dot_dimension_numbers<[1], [0], [0], [1], [0, 0, 1, 1], [], []>} : vector<4x4xbf16>, vector<4x256xbf16>, vector<4x256xf32> -> vector<4x256xf32>
    %152 = arith.addf %148, %151 : vector<4x256xf32>
    %cst_110 = arith.constant 0.000000e+00 : bf16
    %153 = vector.broadcast %cst_110 : bf16 to vector<4x1xbf16>
    %154 = vector.extract_strided_slice %109 {offsets = [0, 1], sizes = [4, 255], strides = [1, 1]} : vector<4x256xbf16> to vector<4x255xbf16>
    %155 = tpu.concatenate %154, %153 in 1 : vector<4x255xbf16>, vector<4x1xbf16> -> vector<4x256xbf16>
    %cst_111 = arith.constant 0.000000e+00 : bf16
    %156 = vector.broadcast %cst_111 : bf16 to vector<4x256xbf16>
    %157 = vector.shape_cast %8 : vector<1x256xi1> to vector<1x256xi1>
    %158 = vector.broadcast %157 : vector<1x256xi1> to vector<4x256xi1>
    %159 = arith.select %158, %155, %156 : vector<4x256xi1>, vector<4x256xbf16>
    %c1_112 = arith.constant 1 : index
    %c2_113 = arith.constant 2 : index
    %c0_114 = arith.constant 0 : index
    %c0_115 = arith.constant 0 : index
    %160 = vector.load %arg4[%c1_112, %c2_113, %c0_114, %c0_115] : memref<3x3x4x4xbf16, #tpu.memory_space<vmem>>, vector<1x1x4x4xbf16>
    %161 = vector.shape_cast %160 : vector<1x1x4x4xbf16> to vector<4x4xbf16>
    %cst_116 = arith.constant dense<0.000000e+00> : vector<4x256xf32>
    %162 = tpu.matmul %161, %159, %cst_116 {dimension_numbers = #tpu.dot_dimension_numbers<[1], [0], [0], [1], [0, 0, 1, 1], [], []>} : vector<4x4xbf16>, vector<4x256xbf16>, vector<4x256xf32> -> vector<4x256xf32>
    %163 = arith.addf %152, %162 : vector<4x256xf32>
    %cst_117 = arith.constant 0.000000e+00 : bf16
    %164 = vector.broadcast %cst_117 : bf16 to vector<4x15xbf16>
    %165 = vector.extract_strided_slice %109 {offsets = [0, 15], sizes = [4, 241], strides = [1, 1]} : vector<4x256xbf16> to vector<4x241xbf16>
    %166 = tpu.concatenate %165, %164 in 1 : vector<4x241xbf16>, vector<4x15xbf16> -> vector<4x256xbf16>
    %cst_118 = arith.constant 0.000000e+00 : bf16
    %167 = vector.broadcast %cst_118 : bf16 to vector<4x256xbf16>
    %168 = vector.shape_cast %6 : vector<1x256xi1> to vector<1x256xi1>
    %169 = vector.broadcast %168 : vector<1x256xi1> to vector<4x256xi1>
    %170 = arith.select %169, %166, %167 : vector<4x256xi1>, vector<4x256xbf16>
    %c2_119 = arith.constant 2 : index
    %c0_120 = arith.constant 0 : index
    %c0_121 = arith.constant 0 : index
    %c0_122 = arith.constant 0 : index
    %171 = vector.load %arg4[%c2_119, %c0_120, %c0_121, %c0_122] : memref<3x3x4x4xbf16, #tpu.memory_space<vmem>>, vector<1x1x4x4xbf16>
    %172 = vector.shape_cast %171 : vector<1x1x4x4xbf16> to vector<4x4xbf16>
    %cst_123 = arith.constant dense<0.000000e+00> : vector<4x256xf32>
    %173 = tpu.matmul %172, %170, %cst_123 {dimension_numbers = #tpu.dot_dimension_numbers<[1], [0], [0], [1], [0, 0, 1, 1], [], []>} : vector<4x4xbf16>, vector<4x256xbf16>, vector<4x256xf32> -> vector<4x256xf32>
    %174 = arith.addf %163, %173 : vector<4x256xf32>
    %cst_124 = arith.constant 0.000000e+00 : bf16
    %175 = vector.broadcast %cst_124 : bf16 to vector<4x16xbf16>
    %176 = vector.extract_strided_slice %109 {offsets = [0, 16], sizes = [4, 240], strides = [1, 1]} : vector<4x256xbf16> to vector<4x240xbf16>
    %177 = tpu.concatenate %176, %175 in 1 : vector<4x240xbf16>, vector<4x16xbf16> -> vector<4x256xbf16>
    %c2_125 = arith.constant 2 : index
    %c1_126 = arith.constant 1 : index
    %c0_127 = arith.constant 0 : index
    %c0_128 = arith.constant 0 : index
    %178 = vector.load %arg4[%c2_125, %c1_126, %c0_127, %c0_128] : memref<3x3x4x4xbf16, #tpu.memory_space<vmem>>, vector<1x1x4x4xbf16>
    %179 = vector.shape_cast %178 : vector<1x1x4x4xbf16> to vector<4x4xbf16>
    %cst_129 = arith.constant dense<0.000000e+00> : vector<4x256xf32>
    %180 = tpu.matmul %179, %177, %cst_129 {dimension_numbers = #tpu.dot_dimension_numbers<[1], [0], [0], [1], [0, 0, 1, 1], [], []>} : vector<4x4xbf16>, vector<4x256xbf16>, vector<4x256xf32> -> vector<4x256xf32>
    %181 = arith.addf %174, %180 : vector<4x256xf32>
    %cst_130 = arith.constant 0.000000e+00 : bf16
    %182 = vector.broadcast %cst_130 : bf16 to vector<4x17xbf16>
    %183 = vector.extract_strided_slice %109 {offsets = [0, 17], sizes = [4, 239], strides = [1, 1]} : vector<4x256xbf16> to vector<4x239xbf16>
    %184 = tpu.concatenate %183, %182 in 1 : vector<4x239xbf16>, vector<4x17xbf16> -> vector<4x256xbf16>
    %cst_131 = arith.constant 0.000000e+00 : bf16
    %185 = vector.broadcast %cst_131 : bf16 to vector<4x256xbf16>
    %186 = vector.shape_cast %8 : vector<1x256xi1> to vector<1x256xi1>
    %187 = vector.broadcast %186 : vector<1x256xi1> to vector<4x256xi1>
    %188 = arith.select %187, %184, %185 : vector<4x256xi1>, vector<4x256xbf16>
    %c2_132 = arith.constant 2 : index
    %c2_133 = arith.constant 2 : index
    %c0_134 = arith.constant 0 : index
    %c0_135 = arith.constant 0 : index
    %189 = vector.load %arg4[%c2_132, %c2_133, %c0_134, %c0_135] : memref<3x3x4x4xbf16, #tpu.memory_space<vmem>>, vector<1x1x4x4xbf16>
    %190 = vector.shape_cast %189 : vector<1x1x4x4xbf16> to vector<4x4xbf16>
    %cst_136 = arith.constant dense<0.000000e+00> : vector<4x256xf32>
    %191 = tpu.matmul %190, %188, %cst_136 {dimension_numbers = #tpu.dot_dimension_numbers<[1], [0], [0], [1], [0, 0, 1, 1], [], []>} : vector<4x4xbf16>, vector<4x256xbf16>, vector<4x256xf32> -> vector<4x256xf32>
    %192 = arith.addf %181, %191 : vector<4x256xf32>
    %193 = vector.broadcast %2 : vector<4x1xf32> to vector<4x256xf32>
    %194 = arith.mulf %192, %193 : vector<4x256xf32>
    %195 = vector.broadcast %3 : vector<4x1xf32> to vector<4x256xf32>
    %196 = arith.addf %194, %195 : vector<4x256xf32>
    %197 = arith.addf %10, %196 : vector<4x256xf32>
    %cst_137 = arith.constant 1.000000e+00 : f32
    %198 = vector.broadcast %cst_137 : f32 to vector<4x256xf32>
    %199 = arith.cmpf oge, %197, %198 : vector<4x256xf32>
    %200 = arith.extui %199 : vector<4x256xi1> to vector<4x256xi32>
    %201 = arith.sitofp %200 : vector<4x256xi32> to vector<4x256xf32>
    %202 = vector.shape_cast %192 : vector<4x256xf32> to vector<1x4x256xf32>
    %c0_138 = arith.constant 0 : index
    %c0_139 = arith.constant 0 : index
    %c0_140 = arith.constant 0 : index
    %203 = vector.load %arg12[%c0_138, %c0_139, %c0_140] : memref<1x4x256xf32, #tpu.memory_space<vmem>>, vector<1x4x256xf32>
    tpu.vector_store %arg12[%c0_138, %c0_139, %c0_140], %202 {strides = array<i32>} : memref<1x4x256xf32, #tpu.memory_space<vmem>>, vector<1x4x256xf32>,
    %204 = vector.shape_cast %196 : vector<4x256xf32> to vector<1x4x256xf32>
    %c0_141 = arith.constant 0 : index
    %c0_142 = arith.constant 0 : index
    %c0_143 = arith.constant 0 : index
    %205 = vector.load %arg13[%c0_141, %c0_142, %c0_143] : memref<1x4x256xf32, #tpu.memory_space<vmem>>, vector<1x4x256xf32>
    tpu.vector_store %arg13[%c0_141, %c0_142, %c0_143], %204 {strides = array<i32>} : memref<1x4x256xf32, #tpu.memory_space<vmem>>, vector<1x4x256xf32>,
    %206 = vector.shape_cast %197 : vector<4x256xf32> to vector<1x4x256xf32>
    %c0_144 = arith.constant 0 : index
    %c0_145 = arith.constant 0 : index
    %c0_146 = arith.constant 0 : index
    %207 = vector.load %arg14[%c0_144, %c0_145, %c0_146] : memref<1x4x256xf32, #tpu.memory_space<vmem>>, vector<1x4x256xf32>
    tpu.vector_store %arg14[%c0_144, %c0_145, %c0_146], %206 {strides = array<i32>} : memref<1x4x256xf32, #tpu.memory_space<vmem>>, vector<1x4x256xf32>,
    %208 = vector.shape_cast %201 : vector<4x256xf32> to vector<1x4x256xf32>
    %c0_147 = arith.constant 0 : index
    %c0_148 = arith.constant 0 : index
    %c0_149 = arith.constant 0 : index
    %209 = vector.load %arg15[%c0_147, %c0_148, %c0_149] : memref<1x4x256xf32, #tpu.memory_space<vmem>>, vector<1x4x256xf32>
    tpu.vector_store %arg15[%c0_147, %c0_148, %c0_149], %208 {strides = array<i32>} : memref<1x4x256xf32, #tpu.memory_space<vmem>>, vector<1x4x256xf32>,
    return
  }
  func.func @transform_0(%arg0: i32) -> (i32, i32, i32) {
    %c0_i32 = arith.constant 0 : i32
    %c0_i32_0 = arith.constant 0 : i32
    %c0_i32_1 = arith.constant 0 : i32
    return %arg0, %c0_i32, %c0_i32_0 : i32, i32, i32
  }
  func.func @transform_1(%arg0: i32) -> (i32, i32) {
    %c0_i32 = arith.constant 0 : i32
    %c0_i32_0 = arith.constant 0 : i32
    %c0_i32_1 = arith.constant 0 : i32
    return %c0_i32, %c0_i32_0 : i32, i32
  }
  func.func @transform_2(%arg0: i32) -> (i32, i32, i32, i32) {
    %c0_i32 = arith.constant 0 : i32
    %c0_i32_0 = arith.constant 0 : i32
    %c0_i32_1 = arith.constant 0 : i32
    %c0_i32_2 = arith.constant 0 : i32
    %c0_i32_3 = arith.constant 0 : i32
    return %c0_i32, %c0_i32_0, %c0_i32_1, %c0_i32_2 : i32, i32, i32, i32
  }
  func.func @transform_3(%arg0: i32) -> (i32, i32, i32, i32) {
    %c0_i32 = arith.constant 0 : i32
    %c0_i32_0 = arith.constant 0 : i32
    %c0_i32_1 = arith.constant 0 : i32
    %c0_i32_2 = arith.constant 0 : i32
    %c0_i32_3 = arith.constant 0 : i32
    return %c0_i32, %c0_i32_0, %c0_i32_1, %c0_i32_2 : i32, i32, i32, i32
  }
  func.func @transform_4(%arg0: i32) -> (i32, i32) {
    %c0_i32 = arith.constant 0 : i32
    %c0_i32_0 = arith.constant 0 : i32
    %c0_i32_1 = arith.constant 0 : i32
    return %c0_i32, %c0_i32_0 : i32, i32
  }
  func.func @transform_5(%arg0: i32) -> (i32, i32) {
    %c0_i32 = arith.constant 0 : i32
    %c0_i32_0 = arith.constant 0 : i32
    %c0_i32_1 = arith.constant 0 : i32
    return %c0_i32, %c0_i32_0 : i32, i32
  }
  func.func @transform_6(%arg0: i32) -> (i32, i32) {
    %c0_i32 = arith.constant 0 : i32
    %c0_i32_0 = arith.constant 0 : i32
    %c0_i32_1 = arith.constant 0 : i32
    return %c0_i32, %c0_i32_0 : i32, i32
  }
  func.func @transform_7(%arg0: i32) -> (i32, i32) {
    %c0_i32 = arith.constant 0 : i32
    %c0_i32_0 = arith.constant 0 : i32
    %c0_i32_1 = arith.constant 0 : i32
    return %c0_i32, %c0_i32_0 : i32, i32
  }
  func.func @transform_8(%arg0: i32) -> (i32, i32, i32) {
    %c0_i32 = arith.constant 0 : i32
    %c0_i32_0 = arith.constant 0 : i32
    %c0_i32_1 = arith.constant 0 : i32
    return %arg0, %c0_i32, %c0_i32_0 : i32, i32, i32
  }
  func.func @transform_9(%arg0: i32) -> (i32, i32, i32) {
    %c0_i32 = arith.constant 0 : i32
    %c0_i32_0 = arith.constant 0 : i32
    %c0_i32_1 = arith.constant 0 : i32
    return %arg0, %c0_i32, %c0_i32_0 : i32, i32, i32
  }
  func.func @transform_10(%arg0: i32) -> (i32, i32, i32) {
    %c0_i32 = arith.constant 0 : i32
    %c0_i32_0 = arith.constant 0 : i32
    %c0_i32_1 = arith.constant 0 : i32
    return %arg0, %c0_i32, %c0_i32_0 : i32, i32, i32
  }
  func.func @transform_11(%arg0: i32) -> (i32, i32, i32) {
    %c0_i32 = arith.constant 0 : i32
    %c0_i32_0 = arith.constant 0 : i32
    %c0_i32_1 = arith.constant 0 : i32
    return %arg0, %c0_i32, %c0_i32_0 : i32, i32, i32
  }
  func.func @transform_12(%arg0: i32) -> (i32, i32, i32) {
    %c0_i32 = arith.constant 0 : i32
    %c0_i32_0 = arith.constant 0 : i32
    %c0_i32_1 = arith.constant 0 : i32
    return %arg0, %c0_i32, %c0_i32_0 : i32, i32, i32
  }
  func.func @transform_13(%arg0: i32) -> (i32, i32, i32) {
    %c0_i32 = arith.constant 0 : i32
    %c0_i32_0 = arith.constant 0 : i32
    %c0_i32_1 = arith.constant 0 : i32
    return %arg0, %c0_i32, %c0_i32_0 : i32, i32, i32
  }
  func.func @transform_14(%arg0: i32) -> (i32, i32, i32) {
    %c0_i32 = arith.constant 0 : i32
    %c0_i32_0 = arith.constant 0 : i32
    %c0_i32_1 = arith.constant 0 : i32
    return %arg0, %c0_i32, %c0_i32_0 : i32, i32, i32
  }
}

</mosaic_0001>

<bundles_post_ra>
// kernel: basic_block_forward.1
= control target key start
LH: loop header
LB: loop body
LE: loop exit
PB: predicated region body
PF: predicated region fallthrough
CT: control target
= control target key end

     0   :  { %s2007_s29 = smov 0   ;;  %s2355_s0 = inlined_call_operand.vmem [shape: f32[2,4,256], index: 0, kind: input, shape index: {}]   ;;  %s2356_s1 = inlined_call_operand.vmem [shape: s32[1,256], index: 1, kind: input, shape index: {}]   ;;  %s2357_s2 = inlined_call_operand.vmem [shape: bf16[3,3,4,4], index: 2, kind: input, shape index: {}]   ;;  %s2358_s3 = inlined_call_operand.vmem [shape: bf16[3,3,4,4], index: 3, kind: input, shape index: {}]   ;;  %s2359_s4 = inlined_call_operand.vmem [shape: f32[4,1], index: 4, kind: input, shape index: {}]   ;;  %s2360_s5 = inlined_call_operand.vmem [shape: f32[4,1], index: 5, kind: input, shape index: {}]   ;;  %s2361_s6 = inlined_call_operand.vmem [shape: f32[4,1], index: 6, kind: input, shape index: {}]   ;;  %s2362_s7 = inlined_call_operand.vmem [shape: f32[4,1], index: 7, kind: input, shape index: {}]   ;;  %s2363_s8 = inlined_call_operand.vmem [shape: f32[2,4,256], index: 8, kind: output, shape index: {0}]   ;;  %s2364_s9 = inlined_call_operand.vmem [shape: f32[2,4,256], index: 9, kind: output, shape index: {1}]   ;;  %s2365_s10 = inlined_call_operand.vmem [shape: f32[2,4,256], index: 10, kind: output, shape index: {2}]   ;;  %s2366_s11 = inlined_call_operand.vmem [shape: f32[2,4,256], index: 11, kind: output, shape index: {3}]   ;;  %s2367_s12 = inlined_call_operand.vmem [shape: f32[2,4,256], index: 12, kind: output, shape index: {4}]   ;;  %s2368_s13 = inlined_call_operand.vmem [shape: f32[2,4,256], index: 13, kind: output, shape index: {5}]   ;;  %s2369_s14 = inlined_call_operand.vmem [shape: f32[2,4,256], index: 14, kind: output, shape index: {6}]  }
   0x1 LB: > { %s1807_s30 = sadd.s32 4294967295, %s1920_s29   ;;  %p1811_p0 = scmp.ge.s32.totalorder %s1920_s29, 1  ;;  %s1920_s29 = sphi %s2007_s29, %s25_s29  }
   0x2   : > { %p425_p1 = scmp.lt.s32.totalorder %s1920_s29, 3 }
   0x4   : > { %p426_p2 = pnand %p1811_p0, %p425_p1 }
   0x5   : > { %p501_p3 = scmp.lt.s32.totalorder (!%p426_p2), %s1807_s30, 1  ;;  %s1922_s19 = smov (!%p426_p2), 17  }
   0x6   : > { %429 = sbr.rel (%p426_p2) target bundleno = 692 (0x2b4), region = 52  ;;  %s1923_s20 = smov (!%p426_p2), 16  }
   0x7   : > { %s1924_s21 = smov (!%p426_p2), 15   ;;  %s1925_s22 = smov (!%p426_p2), 1  }
   0x8   : > { %s1926_s23 = smov (!%p426_p2), 127   ;;  %s1927_s24 = smov (!%p426_p2), 113  }
   0x9   : > { %s2370_s25 = smov (!%p426_p2), 112   ;;  %s2372_s26 = smov (!%p426_p2), 111  }
   0xb   : > { %s2388_s30 = smov (!%p501_p3, %s1807_s30), 1  ;;  %v1930_v8 = vmov 0   ;;  %v548_v9 = vld [vmem:[%s2356_s1] sm:$0x3]  ;;  %vm688_vm8 = vcmask 121856   ;;  %vm606_vm14 = vcmask 130048  }
   0xc   : > { %s2015_s15 = sshll.u32 %s2388_s30, 3  ;;  %1911 = vset.pattern.permute.xlu1 %v1930_v8  ;;  %1912 = vset.pattern.permute.xlu2 %v1930_v8  ;;  %vm549_vm0 = vcmp.ge.s32.totalorder %v548_v9, 1  ;;  %vm550_vm1 = vcmp.le.s32.totalorder %v548_v9, 14  ;;  %v587_v23 = vunpack.c.l.b16 %v1930_v8  ;;  %v588_v24 = vunpack.c.h.b16 %v1930_v8  ;;  %v1828_v46 = vld [vmem:[%s2357_s2 + $0x2] sm:$0x3] }
   0xd   : > { %s505_s18 = scalar_lea.vmem %s2355_s0, %s2015_s15  ;;  %1913 = vset.pattern.permute.xlu0 %v1930_v8  ;;  %v576_v10 = vsel %vm549_vm0, 1, %v1930_v8  ;;  %v695_v11 = vsel %vm550_vm1, 1, %v1930_v8  ;;  %vm568_vm15 = vcmask 138240   ;;  %vm617_vm0 = vcmask 1041408   ;;  %v601_v49 = vld [vmem:[%s2357_s2] sm:$0x3]  ;;  %s510_s17 = scalar_lea.vmem %s2363_s8, %s2015_s15 }
   0xe   : > { %v2021_v0 = vld [vmem:[%s505_s18] sm:$0xff]  ;;  %v577_v12 = vperm.slane %v576_v10, 0  ;;  %v578_v13 = vperm.slane %v576_v10, 1  ;;  %v696_v14 = vperm.slane %v695_v11, 0  ;;  %v697_v15 = vperm.slane %v695_v11, 1  ;;  %s515_s28 = scalar_lea.vmem %s2364_s9, %s2015_s15  ;;  %s525_s16 = scalar_lea.vmem %s2366_s11, %s2015_s15 }
   0xf   : > { %553 = vst [vmem:[#allocation1] ss:$2 sm:$0xff] %v2021_v0  ;;  %v1836_v9 = vld [vmem:[%s2357_s2 + $0x6] sm:$0x3] }
  0x10   : > { %vm698_vm2 = vcmp.eq.s32.totalorder %v696_v14, 1  ;;  %vm699_vm3 = vcmp.eq.s32.totalorder %v697_v15, 1  ;;  %vm579_vm4 = vcmp.eq.s32.totalorder %v577_v12, 1  ;;  %vm580_vm5 = vcmp.eq.s32.totalorder %v578_v13, 1 }
  0x11   : > { %vm700_vm6 = vmpackc.low %vm699_vm3, %vm698_vm2 }
  0x12   : > { %vm581_vm7 = vmpackc.low %vm580_vm5, %vm579_vm4  ;;  %v701_v16 = vsel %vm700_vm6, 65537, %v1930_v8  ;;  %vm613_vm4 = vcmask 31744  }
  0x13   : > { %v582_v17 = vsel %vm581_vm7, 65537, %v1930_v8  ;;  %v702_v18 = vperm.slane %v701_v16, 0  ;;  %v703_v27 = vperm.slane %v701_v16, 4 }
  0x14   : > { %v583_v19 = vperm.slane %v582_v17, 0  ;;  %v584_v30 = vperm.slane %v582_v17, 4 }
  0x15   : > { %v704_v20 = vunpack.c.l.b16 %v702_v18  ;;  %v705_v21 = vunpack.c.h.b16 %v702_v18  ;;  %v711_v31 = vunpack.c.l.b16 %v703_v27  ;;  %v712_v32 = vunpack.c.h.b16 %v703_v27 }
  0x16   : > { %v554_v1 = vld.sshfl [vmem:[#allocation1] sm:$0xff pattern:$0x75316420]  ;;  %v555_v2 = vld.sshfl [vmem:[#allocation1 + $0x8] sm:$0xff pattern:$0x75316420]  ;;  %v585_v25 = vunpack.c.l.b16 %v583_v19  ;;  %v586_v26 = vunpack.c.h.b16 %v583_v19  ;;  %v592_v38 = vunpack.c.l.b16 %v584_v30  ;;  %v593_v39 = vunpack.c.h.b16 %v584_v30 }
  0x17   : > { %v558_v3 = vpack.c.bf16 %v555_v2, %v554_v1  ;;  %vm708_vm9 = vcmp.ne.s32.totalorder %v704_v20, %v587_v23  ;;  %vm709_vm10 = vcmp.ne.s32.totalorder %v705_v21, %v588_v24  ;;  %vm715_vm2 = vcmp.ne.s32.totalorder %v711_v31, %v587_v23 }
  0x18   : > { %vm589_vm11 = vcmp.ne.s32.totalorder %v585_v25, %v587_v23  ;;  %vm2064_vm12 = vmpackc.low %vm709_vm10, %vm708_vm9  ;;  %vm590_vm13 = vcmp.ne.s32.totalorder %v586_v26, %v588_v24  ;;  %vm716_vm3 = vcmp.ne.s32.totalorder %v712_v32, %v588_v24  ;;  %vm596_vm6 = vcmp.ne.s32.totalorder %v592_v38, %v587_v23  ;;  %v1839_v32 = vld [vmem:[%s2357_s2 + $0x8] sm:$0x3] }
  0x19   : > { %v560_v4 = vunpack.c.l.b16 %v558_v3  ;;  %v561_v6 = vunpack.c.h.b16 %v558_v3  ;;  %vm2070_vm1 = vmpackc.low %vm590_vm13, %vm589_vm11  ;;  %vm597_vm7 = vcmp.ne.s32.totalorder %v593_v39, %v588_v24  ;;  %vm763_vm10 = vcmask 7168  }
  0x1a   : > { %vm2085_vm5 = vmpackc.low %vm716_vm3, %vm715_vm2  ;;  %vm906_vm11 = vcmask 924672   ;;  %vm854_vm13 = vcmask 1039360   ;;  %vm958_vm2 = vcmask 916480   ;;  %vm2374_vm3 = vcmask 908288  }
  0x1b   : > { %v2024_v5 = vpack.c.b16 %v560_v4, %v560_v4  ;;  %v2032_v7 = vpack.c.b16 %v561_v6, %v561_v6  ;;  %vm2098_vm9 = vmpackc.low %vm597_vm7, %vm596_vm6  ;;  %vm1076_vm6 = vcmask 1043456  }
  0x1d   : > { %564 = vrot.lane.b32.xlu1 %v2024_v5, %s1922_s19  ;;  %602 = vrot.lane.b32.xlu0 %v2024_v5, %s1923_s20  ;;  %v817_v50 = vsel %vm617_vm0, %v2024_v5, 0  ;;  %v820_v61 = vsel %vm617_vm0, %v2032_v7, 0 }
  0x1e   : > { %684 = vrot.lane.b32.xlu2 %v2024_v5, %s1924_s21 }
  0x25   : > { %566 = vrot.lane.b32.xlu1 %v2032_v7, %s1922_s19  ;;  %604 = vrot.lane.b32.xlu0 %v2032_v7, %s1923_s20 }
  0x26   : > { %686 = vrot.lane.b32.xlu2 %v2032_v7, %s1924_s21 }
  0x2d   : > { %759 = vrot.lane.b32.xlu0 %v2024_v5, %s1925_s22  ;;  %761 = vrot.lane.b32.xlu1 %v2032_v7, %s1925_s22 }
  0x2e   : > { %850 = vrot.lane.b32.xlu2 %v2024_v5, %s1926_s23 }
  0x35   : > { %852 = vrot.lane.b32.xlu0 %v2032_v7, %s1926_s23  ;;  %902 = vrot.lane.b32.xlu1 %v2024_v5, %s1927_s24 }
  0x36   : > { %904 = vrot.lane.b32.xlu2 %v2032_v7, %s1927_s24 }
  0x3d   : > { %956 = vrot.lane.b32.xlu1 %v2032_v7, %s2370_s25  ;;  %954 = vrot.lane.b32.xlu0 %v2024_v5, %s2370_s25  ;;  %s520_s25 = scalar_lea.vmem %s2365_s10, %s2015_s15 }
  0x3e   : > { %1001 = vrot.lane.b32.xlu2 %v2024_v5, %s2372_s26 }
  0x45   : > { %1003 = vrot.lane.b32.xlu0 %v2032_v7, %s2372_s26  ;;  %v1833_v7 = vld [vmem:[%s2357_s2 + $0x4] sm:$0x3]  ;;  %s2383_s26 = smov 111  }
  0x78   : > { %v685_v22 = vpop.permute.xlu2 %684 }
  0x79   : > { %v693_v28 = vsel %vm688_vm8, 0, %v685_v22 }
  0x7a   : > { %v718_v33 = vsel %vm2064_vm12, %v693_v28, 0 }
  0x7b   : > { %v726_v42 = vsel %vm617_vm0, %v718_v33, 0  ;;  %v1842_v33 = vld [vmem:[%s2357_s2 + $0xa] sm:$0x3] }
  0x80   : > { %v687_v35 = vpop.permute.xlu2 %686 }
  0x81   : > { %v689_v47 = vsel %vm688_vm8, %v685_v22, %v687_v35 }
  0x82   : > { %v719_v51 = vsel %vm2085_vm5, %v689_v47, 0  ;;  %v1851_v47 = vld [vmem:[%s2357_s2 + $0x10] sm:$0x3] }
  0x83   : > { %v729_v57 = vsel %vm617_vm0, %v719_v51, 0 }
  0x88   : > { %v851_v62 = vpop.permute.xlu2 %850 }
  0x8f   : > { %v565_v36 = vpop.permute.xlu1 %564  ;;  %v603_v37 = vpop.permute.xlu0 %602 }
  0x90   : > { %v610_v40 = vsel %vm606_vm14, 0, %v603_v37  ;;  %v574_v41 = vsel %vm568_vm15, 0, %v565_v36  ;;  %v905_v10 = vpop.permute.xlu2 %904 }
  0x91   : > { %v618_v43 = vsel %vm617_vm0, %v610_v40, 0  ;;  %v599_v44 = vsel %vm2070_vm1, %v574_v41, 0  ;;  %v911_v11 = vsel %vm906_vm11, %v905_v10, 0 }
  0x92   : > { %630 = vmatpush.bf16.msra.mxu0 %v618_v43  ;;  %v653_v45 = vsel %vm617_vm0, %v599_v44, 0  ;;  %v914_v17 = vsel %vm2098_vm9, %v911_v11, 0  ;;  %v544_v43 = vld [vmem:[%s2359_s4] sm:$0xf] }
  0x93   : > { %665 = vmatpush.bf16.msra.mxu2 %v653_v45  ;;  %v924_v24 = vsel %vm617_vm0, %v914_v17, 0  ;;  %v545_v44 = vld [vmem:[%s2360_s5] sm:$0xf]  ;;  %1055 = vperm.xlu1 %1911, %v544_v43   ;;  %v1845_v45 = vld [vmem:[%s2357_s2 + $0xc] sm:$0x3] }
  0x94   : > { %1062 = vperm.xlu2 %1912, %v545_v44  }
  0x95   : > { %1829 = vmatmul.msk.bf16.vlgmr.msra.gmra.mxu0 %vm613_vm4, %v1828_v46 }
  0x96   : > { %738 = vmatpush.bf16.msrb.mxu0 %v726_v42  ;;  %1831 = vmatmul.msk.bf16.vlgmr.msra.gmra.mxu2 %vm613_vm4, %v601_v49 }
  0x97   : > { %v567_v53 = vpop.permute.xlu1 %566  ;;  %v605_v54 = vpop.permute.xlu0 %604 }
  0x98   : > { %v607_v55 = vsel %vm606_vm14, %v603_v37, %v605_v54  ;;  %v569_v56 = vsel %vm568_vm15, %v565_v36, %v567_v53  ;;  %v1002_v35 = vpop.permute.xlu2 %1001 }
  0x99   : > { %v621_v58 = vsel %vm617_vm0, %v607_v55, 0  ;;  %v600_v59 = vsel %vm2098_vm9, %v569_v56, 0 }
  0x9a   : > { %829 = vmatpush.bf16.msra.mxu0 %v817_v50  ;;  %643 = vmatpush.bf16.msra.mxu1 %v621_v58  ;;  %v656_v60 = vsel %vm617_vm0, %v600_v59, 0 }
  0x9b   : > { %678 = vmatpush.bf16.msra.mxu3 %v656_v60 }
  0x9d   : > { %1830 = vmatmul.msk.bf16.vlgmr.msra.gmra.mxu1 %vm613_vm4, %v1828_v46  ;;  %v1848_v46 = vld [vmem:[%s2357_s2 + $0xe] sm:$0x3] }
  0x9e   : > { %751 = vmatpush.bf16.msrb.mxu1 %v729_v57  ;;  %1832 = vmatmul.msk.bf16.vlgmr.msra.gmra.mxu3 %vm613_vm4, %v601_v49 }
  0x9f   : > { %v760_v63 = vpop.permute.xlu0 %759  ;;  %v762_v1 = vpop.permute.xlu1 %761 }
  0xa0   : > { %v768_v2 = vsel %vm763_vm10, 0, %v760_v63  ;;  %v764_v3 = vsel %vm763_vm10, %v760_v63, %v762_v1 }
  0xa1   : > { %v770_v4 = vsel %vm2070_vm1, %v768_v2, 0  ;;  %v771_v5 = vsel %vm2098_vm9, %v764_v3, 0 }
  0xa2   : > { %842 = vmatpush.bf16.msra.mxu1 %v820_v61  ;;  %v778_v6 = vsel %vm617_vm0, %v770_v4, 0  ;;  %v781_v8 = vsel %vm617_vm0, %v771_v5, 0 }
  0xa3   : > { %790 = vmatpush.bf16.msrb.mxu2 %v778_v6  ;;  %803 = vmatpush.bf16.msrb.mxu3 %v781_v8 }
  0xa5   : > { %1834 = vmatmul.msk.bf16.vlgmr.msrb.gmra.mxu0 %vm613_vm4, %v1833_v7 }
  0xa6   : > { %1837 = vmatmul.msk.bf16.vlgmr.msrb.gmra.mxu2 %vm613_vm4, %v1836_v9 }
  0xa7   : > { %v853_v12 = vpop.permute.xlu0 %852  ;;  %v903_v13 = vpop.permute.xlu1 %902 }
  0xa8   : > { %v855_v14 = vsel %vm854_vm13, %v851_v62, %v853_v12  ;;  %v859_v15 = vsel %vm854_vm13, %v853_v12, 0  ;;  %v907_v16 = vsel %vm906_vm11, %v903_v13, %v905_v10 }
  0xa9   : > { %v861_v18 = vsel %vm2064_vm12, %v855_v14, 0  ;;  %v862_v19 = vsel %vm2085_vm5, %v859_v15, 0  ;;  %v913_v20 = vsel %vm2070_vm1, %v907_v16, 0 }
  0xaa   : > { %v869_v21 = vsel %vm617_vm0, %v861_v18, 0  ;;  %v872_v22 = vsel %vm617_vm0, %v862_v19, 0  ;;  %v921_v23 = vsel %vm617_vm0, %v913_v20, 0 }
  0xab   : > { %881 = vmatpush.bf16.msra.mxu2 %v869_v21  ;;  %894 = vmatpush.bf16.msra.mxu3 %v872_v22 }
  0xac   : > { %933 = vmatpush.bf16.msrb.mxu0 %v921_v23 }
  0xad   : > { %1835 = vmatmul.msk.bf16.vlgmr.msrb.gmra.mxu1 %vm613_vm4, %v1833_v7 }
  0xae   : > { %1838 = vmatmul.msk.bf16.vlgmr.msrb.gmra.mxu3 %vm613_vm4, %v1836_v9  ;;  %946 = vmatpush.bf16.msrb.mxu1 %v924_v24 }
  0xaf   : > { %v957_v25 = vpop.permute.xlu1 %956  ;;  %v955_v26 = vpop.permute.xlu0 %954 }
  0xb0   : > { %v962_v27 = vsel %vm958_vm2, %v957_v25, 0  ;;  %v959_v28 = vsel %vm958_vm2, %v955_v26, %v957_v25 }
  0xb1   : > { %v971_v30 = vsel %vm617_vm0, %v962_v27, 0  ;;  %v969_v31 = vsel %vm617_vm0, %v959_v28, 0 }
  0xb2   : > { %980 = vmatpush.bf16.msrb.mxu2 %v969_v31  ;;  %993 = vmatpush.bf16.msrb.mxu3 %v971_v30 }
  0xb5   : > { %1840 = vmatmul.msk.bf16.vlgmr.msra.gmra.mxu0 %vm613_vm4, %v1839_v32 }
  0xb6   : > { %1843 = vmatmul.msk.bf16.vlgmr.msra.gmra.mxu2 %vm613_vm4, %v1842_v33 }
  0xb7   : > { %v1004_v36 = vpop.permute.xlu0 %1003 }
  0xb8   : > { %v1006_v37 = vsel %vm2374_vm3, %v1002_v35, %v1004_v36  ;;  %v1010_v38 = vsel %vm2374_vm3, %v1004_v36, 0 }
  0xb9   : > { %v1012_v39 = vsel %vm2064_vm12, %v1006_v37, 0  ;;  %v1013_v40 = vsel %vm2085_vm5, %v1010_v38, 0 }
  0xba   : > { %v1020_v41 = vsel %vm617_vm0, %v1012_v39, 0  ;;  %v1023_v42 = vsel %vm617_vm0, %v1013_v40, 0 }
  0xbb   : > { %1032 = vmatpush.bf16.msra.mxu0 %v1020_v41 }
  0xbd   : > { %1841 = vmatmul.msk.bf16.vlgmr.msra.gmra.mxu1 %vm613_vm4, %v1839_v32 }
  0xbe   : > { %1844 = vmatmul.msk.bf16.vlgmr.msra.gmra.mxu3 %vm613_vm4, %v1842_v33  ;;  %1045 = vmatpush.bf16.msra.mxu1 %v1023_v42 }
  0xc5   : > { %1846 = vmatmul.msk.bf16.vlgmr.msrb.gmra.mxu0 %vm613_vm4, %v1845_v45 }
  0xc6   : > { %1849 = vmatmul.msk.bf16.vlgmr.msrb.gmra.mxu2 %vm613_vm4, %v1848_v46 }
  0xcd   : > { %1847 = vmatmul.msk.bf16.vlgmr.msrb.gmra.mxu1 %vm613_vm4, %v1845_v45 }
  0xce   : > { %1850 = vmatmul.msk.bf16.vlgmr.msrb.gmra.mxu3 %vm613_vm4, %v1848_v46 }
  0xd5   : > { %1852 = vmatmul.msk.bf16.vlgmr.msra.gmra.mxu0 %vm613_vm4, %v1851_v47 }
  0xdd   : > { %1853 = vmatmul.msk.bf16.vlgmr.msra.gmra.mxu1 %vm613_vm4, %v1851_v47 }
  0xee   : > { %v1063_v37 = vpop.permute.xlu2 %1062 }
 0x105   : > { %v1056_v32 = vpop.permute.xlu1 %1055 }
 0x112   : > { %v632_v49 = vpop.f32.mrf.mxu0 }
 0x119   : > { %v667_v50 = vpop.f32.mrf.mxu2 }
 0x11a   : > { %v634_v51 = vpop.f32.mrf.mxu0  ;;  %v645_v53 = vpop.f32.mrf.mxu1  ;;  %v668_v11 = vadd.f32 %v667_v50, %v632_v49  ;;  %v1931_v50 = vmov 0.0  }
 0x121   : > { %v669_v54 = vpop.f32.mrf.mxu2  ;;  %v680_v55 = vpop.f32.mrf.mxu3 }
 0x122   : > { %v647_v56 = vpop.f32.mrf.mxu1  ;;  %v740_v57 = vpop.f32.mrf.mxu0  ;;  %v681_v19 = vadd.f32 %v680_v55, %v645_v53 }
 0x123   : > { %v757_v12 = vadd.f32 %v740_v57, %v668_v11 }
 0x129   : > { %v682_v58 = vpop.f32.mrf.mxu3  ;;  %v792_v59 = vpop.f32.mrf.mxu2 }
 0x12a   : > { %v742_v60 = vpop.f32.mrf.mxu0  ;;  %v753_v61 = vpop.f32.mrf.mxu1  ;;  %v809_v13 = vadd.f32 %v792_v59, %v757_v12 }
 0x12b   : > { %v758_v21 = vadd.f32 %v753_v61, %v681_v19 }
 0x131   : > { %v794_v62 = vpop.f32.mrf.mxu2  ;;  %v805_v63 = vpop.f32.mrf.mxu3 }
 0x132   : > { %v755_v1 = vpop.f32.mrf.mxu1  ;;  %v831_v2 = vpop.f32.mrf.mxu0  ;;  %v810_v23 = vadd.f32 %v805_v63, %v758_v21  ;;  %v546_v63 = vld [vmem:[%s2361_s6] sm:$0xf] }
 0x133   : > { %v848_v18 = vadd.f32 %v831_v2, %v809_v13  ;;  %v547_v1 = vld [vmem:[%s2362_s7] sm:$0xf] }
 0x134   : > { %v1856_v13 = vld [vmem:[%s2358_s3 + $0x2] sm:$0x3] }
 0x139   : > { %v807_v3 = vpop.f32.mrf.mxu3  ;;  %v883_v4 = vpop.f32.mrf.mxu2 }
 0x13a   : > { %v833_v5 = vpop.f32.mrf.mxu0  ;;  %v844_v6 = vpop.f32.mrf.mxu1  ;;  %v900_v20 = vadd.f32 %v883_v4, %v848_v18 }
 0x13b   : > { %v849_v30 = vadd.f32 %v844_v6, %v810_v23 }
 0x141   : > { %v885_v7 = vpop.f32.mrf.mxu2  ;;  %v896_v8 = vpop.f32.mrf.mxu3 }
 0x142   : > { %v846_v9 = vpop.f32.mrf.mxu1  ;;  %v935_v10 = vpop.f32.mrf.mxu0  ;;  %v901_v33 = vadd.f32 %v896_v8, %v849_v30 }
 0x143   : > { %v952_v22 = vadd.f32 %v935_v10, %v900_v20 }
 0x149   : > { %v898_v14 = vpop.f32.mrf.mxu3  ;;  %v982_v15 = vpop.f32.mrf.mxu2 }
 0x14a   : > { %v937_v16 = vpop.f32.mrf.mxu0  ;;  %v948_v17 = vpop.f32.mrf.mxu1  ;;  %v999_v24 = vadd.f32 %v982_v15, %v952_v22 }
 0x14b   : > { %v953_v35 = vadd.f32 %v948_v17, %v901_v33 }
 0x151   : > { %v995_v25 = vpop.f32.mrf.mxu3  ;;  %v984_v26 = vpop.f32.mrf.mxu2 }
 0x152   : > { %v950_v27 = vpop.f32.mrf.mxu1  ;;  %v1034_v28 = vpop.f32.mrf.mxu0  ;;  %v1000_v38 = vadd.f32 %v995_v25, %v953_v35 }
 0x153   : > { %v1051_v31 = vadd.f32 %v1034_v28, %v999_v24  ;;  %v1109_v27 = vld [vmem:[%s2358_s3] sm:$0x3] }
 0x155   : > { %v1058_v36 = vmul.f32 %v1056_v32, %v1051_v31 }
 0x157   : > { %v1065_v42 = vadd.f32 %v1063_v37, %v1058_v36 }
 0x159   : > { %v997_v39 = vpop.f32.mrf.mxu3  ;;  %vm1067_vm7 = vcmp.ge.f32.partialorder %v1065_v42, 1.0 }
 0x15a   : > { %v1036_v40 = vpop.f32.mrf.mxu0  ;;  %v1047_v41 = vpop.f32.mrf.mxu1  ;;  %v1854_v51 = vsel %vm1067_vm7, 1.0, %v1931_v50 }
 0x15b   : > { %v1052_v43 = vadd.f32 %v1047_v41, %v1000_v38 }
 0x15d   : > { %v1059_v44 = vmul.f32 %v1056_v32, %v1052_v43  ;;  %v1075_v45 = vrot.slane %v1052_v43, 4 }
 0x15f   : > { %v1066_v46 = vadd.f32 %v1063_v37, %v1059_v44  ;;  %v1077_v47 = vsel %vm1076_vm6, %v1051_v31, %v1075_v45 }
 0x160   : > { %1079 = vst [vmem:[%s510_s17] sm:$0xff] %v1077_v47  ;;  %s535_s17 = scalar_lea.vmem %s2368_s13, %s2015_s15 }
 0x161   : > { %vm1068_vm3 = vcmp.ge.f32.partialorder %v1066_v46, 1.0  ;;  %v1082_v49 = vrot.slane %v1066_v46, 4 }
 0x162   : > { %v1855_v53 = vsel %vm1068_vm3, 1.0, %v1931_v50  ;;  %v1049_v54 = vpop.f32.mrf.mxu1 }
 0x163   : > { %v1083_v55 = vsel %vm1076_vm6, %v1065_v42, %v1082_v49  ;;  %v1088_v56 = vrot.slane %v1855_v53, 4  ;;  %v1092_v57 = vpack.c.bf16 %v1855_v53, %v1854_v51  ;;  %v1861_v42 = vld [vmem:[%s2358_s3 + $0x4] sm:$0x3] }
 0x164   : > { %1085 = vst [vmem:[%s515_s28] sm:$0xff] %v1083_v55 }
 0x165   : > { %v1089_v58 = vsel %vm1076_vm6, %v1854_v51, %v1088_v56  ;;  %v1094_v59 = vunpack.c.l.b16 %v1092_v57  ;;  %v1095_v60 = vunpack.c.h.b16 %v1092_v57 }
 0x166   : > { %1091 = vst [vmem:[%s520_s25] sm:$0xff] %v1089_v58 }
 0x167   : > { %v1096_v61 = vpack.c.b16 %v1094_v59, %v1094_v59  ;;  %v1097_v62 = vpack.c.b16 %v1095_v60, %v1095_v60  ;;  %v1864_v59 = vld [vmem:[%s2358_s3 + $0x6] sm:$0x3] }
 0x169   : > { %1112 = vrot.lane.b32.xlu1 %v1097_v62, %s1923_s20  ;;  %1188 = vrot.lane.b32.xlu2 %v1096_v61, %s1924_s21  ;;  %v1294_v15 = vsel %vm617_vm0, %v1096_v61, 0  ;;  %v1297_v28 = vsel %vm617_vm0, %v1097_v62, 0 }
 0x16a   : > { %1110 = vrot.lane.b32.xlu0 %v1096_v61, %s1923_s20  ;;  %s2384_s20 = smov 112  }
 0x171   : > { %1098 = vrot.lane.b32.xlu1 %v1096_v61, %s1922_s19  ;;  %1100 = vrot.lane.b32.xlu2 %v1097_v62, %s1922_s19 }
 0x172   : > { %1190 = vrot.lane.b32.xlu0 %v1097_v62, %s1924_s21 }
 0x179   : > { %1240 = vrot.lane.b32.xlu1 %v1097_v62, %s1925_s22  ;;  %1379 = vrot.lane.b32.xlu2 %v1097_v62, %s1927_s24 }
 0x17a   : > { %1238 = vrot.lane.b32.xlu0 %v1096_v61, %s1925_s22 }
 0x181   : > { %1329 = vrot.lane.b32.xlu1 %v1097_v62, %s1926_s23  ;;  %1327 = vrot.lane.b32.xlu2 %v1096_v61, %s1926_s23  ;;  %s540_s23 = scalar_lea.vmem %s2369_s14, %s2015_s15 }
 0x182   : > { %1377 = vrot.lane.b32.xlu0 %v1096_v61, %s1927_s24 }
 0x189   : > { %1472 = vrot.lane.b32.xlu1 %v1096_v61, %s2383_s26  ;;  %1429 = vrot.lane.b32.xlu2 %v1097_v62, %s2384_s20 }
 0x18a   : > { %1474 = vrot.lane.b32.xlu0 %v1097_v62, %s2383_s26 }
 0x191   : > { %1524 = vperm.xlu1 %1911, %v546_v63   ;;  %1531 = vperm.xlu2 %1912, %v547_v1  }
 0x192   : > { %1427 = vrot.lane.b32.xlu0 %v1096_v61, %s2384_s20  ;;  %s530_s20 = scalar_lea.vmem %s2367_s12, %s2015_s15 }
 0x1c3   : > { %v1189_v2 = vpop.permute.xlu2 %1188 }
 0x1c4   : > { %v1195_v4 = vsel %vm688_vm8, 0, %v1189_v2 }
 0x1c5   : > { %v1197_v6 = vsel %vm2064_vm12, %v1195_v4, 0 }
 0x1c6   : > { %v1205_v12 = vsel %vm617_vm0, %v1197_v6, 0 }
 0x1cb   : > { %v1101_v3 = vpop.permute.xlu2 %1100 }
 0x1d3   : > { %v1380_v14 = vpop.permute.xlu2 %1379 }
 0x1d4   : > { %v1384_v32 = vsel %vm906_vm11, %v1380_v14, 0 }
 0x1d5   : > { %v1387_v39 = vsel %vm2098_vm9, %v1384_v32, 0 }
 0x1d6   : > { %v1397_v43 = vsel %vm617_vm0, %v1387_v39, 0 }
 0x1db   : > { %v1113_v5 = vpop.permute.xlu1 %1112  ;;  %v1328_v30 = vpop.permute.xlu2 %1327 }
 0x1dc   : > { %v1111_v7 = vpop.permute.xlu0 %1110 }
 0x1dd   : > { %v1114_v8 = vsel %vm606_vm14, %v1111_v7, %v1113_v5  ;;  %v1116_v9 = vsel %vm606_vm14, 0, %v1111_v7  ;;  %v1870_v7 = vld [vmem:[%s2358_s3 + $0xa] sm:$0x3] }
 0x1de   : > { %v1122_v10 = vsel %vm617_vm0, %v1116_v9, 0  ;;  %v1125_v11 = vsel %vm617_vm0, %v1114_v8, 0  ;;  %v1873_v8 = vld [vmem:[%s2358_s3 + $0xc] sm:$0x3]  ;;  %v1876_v9 = vld [vmem:[%s2358_s3 + $0xe] sm:$0x3] }
 0x1df   : > { %1134 = vmatpush.bf16.msra.mxu2 %v1122_v10  ;;  %1147 = vmatpush.bf16.msra.mxu3 %v1125_v11  ;;  %v1879_v10 = vld [vmem:[%s2358_s3 + $0x10] sm:$0x3] }
 0x1e2   : > { %1857 = vmatmul.msk.bf16.vlgmr.msra.gmra.mxu2 %vm613_vm4, %v1856_v13  ;;  %1858 = vmatmul.msk.bf16.vlgmr.msra.gmra.mxu3 %vm613_vm4, %v1856_v13 }
 0x1e3   : > { %1217 = vmatpush.bf16.msrb.mxu2 %v1205_v12  ;;  %v1099_v16 = vpop.permute.xlu1 %1098  ;;  %v1430_v52 = vpop.permute.xlu2 %1429 }
 0x1e4   : > { %v1102_v17 = vsel %vm568_vm15, %v1099_v16, %v1101_v3  ;;  %v1105_v18 = vsel %vm568_vm15, 0, %v1099_v16  ;;  %v1191_v19 = vpop.permute.xlu0 %1190  ;;  %v1433_v57 = vsel %vm958_vm2, %v1430_v52, 0  ;;  %v1867_v3 = vld [vmem:[%s2358_s3 + $0x8] sm:$0x3] }
 0x1e5   : > { %v1107_v20 = vsel %vm2070_vm1, %v1105_v18, 0  ;;  %v1108_v21 = vsel %vm2098_vm9, %v1102_v17, 0  ;;  %v1192_v22 = vsel %vm688_vm8, %v1189_v2, %v1191_v19  ;;  %v1442_v60 = vsel %vm617_vm0, %v1433_v57, 0 }
 0x1e6   : > { %v1198_v23 = vsel %vm2085_vm5, %v1192_v22, 0  ;;  %v1157_v24 = vsel %vm617_vm0, %v1107_v20, 0  ;;  %v1160_v25 = vsel %vm617_vm0, %v1108_v21, 0  ;;  %vm2385_vm8 = vcmask 908288  }
 0x1e7   : > { %1306 = vmatpush.bf16.msra.mxu2 %v1294_v15  ;;  %1169 = vmatpush.bf16.msrb.mxu0 %v1157_v24  ;;  %v1208_v26 = vsel %vm617_vm0, %v1198_v23, 0  ;;  %vm2386_vm14 = vmmov %vm2385_vm8 }
 0x1e8   : > { %1182 = vmatpush.bf16.msrb.mxu1 %v1160_v25  ;;  %1230 = vmatpush.bf16.msrb.mxu3 %v1208_v26 }
 0x1ea   : > { %1859 = vmatmul.msk.bf16.vlgmr.msrb.gmra.mxu0 %vm613_vm4, %v1109_v27 }
 0x1eb   : > { %1860 = vmatmul.msk.bf16.vlgmr.msrb.gmra.mxu1 %vm613_vm4, %v1109_v27  ;;  %v1241_v31 = vpop.permute.xlu1 %1240 }
 0x1ec   : > { %1319 = vmatpush.bf16.msra.mxu3 %v1297_v28  ;;  %v1239_v33 = vpop.permute.xlu0 %1238 }
 0x1ed   : > { %v1242_v35 = vsel %vm763_vm10, %v1239_v33, %v1241_v31  ;;  %v1245_v36 = vsel %vm763_vm10, 0, %v1239_v33 }
 0x1ee   : > { %v1247_v37 = vsel %vm2070_vm1, %v1245_v36, 0  ;;  %v1248_v38 = vsel %vm2098_vm9, %v1242_v35, 0 }
 0x1ef   : > { %v1255_v40 = vsel %vm617_vm0, %v1247_v37, 0  ;;  %v1258_v41 = vsel %vm617_vm0, %v1248_v38, 0 }
 0x1f0   : > { %1267 = vmatpush.bf16.msra.mxu0 %v1255_v40  ;;  %1280 = vmatpush.bf16.msra.mxu1 %v1258_v41 }
 0x1f2   : > { %1862 = vmatmul.msk.bf16.vlgmr.msrb.gmra.mxu2 %vm613_vm4, %v1861_v42  ;;  %1863 = vmatmul.msk.bf16.vlgmr.msrb.gmra.mxu3 %vm613_vm4, %v1861_v42 }
 0x1f3   : > { %1419 = vmatpush.bf16.msrb.mxu3 %v1397_v43  ;;  %v1330_v44 = vpop.permute.xlu1 %1329 }
 0x1f4   : > { %v1331_v45 = vsel %vm854_vm13, %v1328_v30, %v1330_v44  ;;  %v1334_v46 = vsel %vm854_vm13, %v1330_v44, 0  ;;  %v1378_v47 = vpop.permute.xlu0 %1377 }
 0x1f5   : > { %v1336_v49 = vsel %vm2064_vm12, %v1331_v45, 0  ;;  %v1337_v51 = vsel %vm2085_vm5, %v1334_v46, 0  ;;  %v1381_v53 = vsel %vm906_vm11, %v1378_v47, %v1380_v14 }
 0x1f6   : > { %v1386_v54 = vsel %vm2070_vm1, %v1381_v53, 0  ;;  %v1344_v55 = vsel %vm617_vm0, %v1336_v49, 0  ;;  %v1347_v56 = vsel %vm617_vm0, %v1337_v51, 0 }
 0x1f7   : > { %1356 = vmatpush.bf16.msrb.mxu0 %v1344_v55  ;;  %1369 = vmatpush.bf16.msrb.mxu1 %v1347_v56  ;;  %v1394_v58 = vsel %vm617_vm0, %v1386_v54, 0 }
 0x1f8   : > { %1406 = vmatpush.bf16.msrb.mxu2 %v1394_v58 }
 0x1fa   : > { %1865 = vmatmul.msk.bf16.vlgmr.msra.gmra.mxu0 %vm613_vm4, %v1864_v59 }
 0x1fb   : > { %1866 = vmatmul.msk.bf16.vlgmr.msra.gmra.mxu1 %vm613_vm4, %v1864_v59  ;;  %v1473_v34 = vpop.permute.xlu1 %1472 }
 0x1fc   : > { %1464 = vmatpush.bf16.msra.mxu1 %v1442_v60  ;;  %v1475_v61 = vpop.permute.xlu0 %1474 }
 0x1fd   : > { %v1476_v62 = vsel %vm2385_vm8, %v1473_v34, %v1475_v61  ;;  %v1479_v63 = vsel %vm2386_vm14, %v1475_v61, 0 }
 0x1fe   : > { %v1481_v1 = vsel %vm2064_vm12, %v1476_v62, 0  ;;  %v1482_v2 = vsel %vm2085_vm5, %v1479_v63, 0 }
 0x1ff   : > { %v1489_v4 = vsel %vm617_vm0, %v1481_v1, 0  ;;  %v1492_v5 = vsel %vm617_vm0, %v1482_v2, 0 }
 0x202   : > { %1868 = vmatmul.msk.bf16.vlgmr.msra.gmra.mxu2 %vm613_vm4, %v1867_v3  ;;  %1869 = vmatmul.msk.bf16.vlgmr.msra.gmra.mxu3 %vm613_vm4, %v1867_v3 }
 0x203   : > { %1501 = vmatpush.bf16.msra.mxu2 %v1489_v4  ;;  %1514 = vmatpush.bf16.msra.mxu3 %v1492_v5  ;;  %v1525_v1 = vpop.permute.xlu1 %1524  ;;  %v1532_v5 = vpop.permute.xlu2 %1531 }
 0x204   : > { %v1428_v6 = vpop.permute.xlu0 %1427 }
 0x205   : > { %v1431_v29 = vsel %vm958_vm2, %v1428_v6, %v1430_v52 }
 0x206   : > { %v1440_v48 = vsel %vm617_vm0, %v1431_v29, 0 }
 0x207   : > { %1451 = vmatpush.bf16.msra.mxu0 %v1440_v48 }
 0x20a   : > { %1871 = vmatmul.msk.bf16.vlgmr.msrb.gmra.mxu0 %vm613_vm4, %v1870_v7 }
 0x20b   : > { %1872 = vmatmul.msk.bf16.vlgmr.msrb.gmra.mxu1 %vm613_vm4, %v1870_v7 }
 0x212   : > { %1874 = vmatmul.msk.bf16.vlgmr.msrb.gmra.mxu2 %vm613_vm4, %v1873_v8  ;;  %1875 = vmatmul.msk.bf16.vlgmr.msrb.gmra.mxu3 %vm613_vm4, %v1873_v8 }
 0x21a   : > { %1877 = vmatmul.msk.bf16.vlgmr.msra.gmra.mxu0 %vm613_vm4, %v1876_v9 }
 0x21b   : > { %1878 = vmatmul.msk.bf16.vlgmr.msra.gmra.mxu1 %vm613_vm4, %v1876_v9 }
 0x222   : > { %1880 = vmatmul.msk.bf16.vlgmr.msra.gmra.mxu2 %vm613_vm4, %v1879_v10  ;;  %1881 = vmatmul.msk.bf16.vlgmr.msra.gmra.mxu3 %vm613_vm4, %v1879_v10 }
 0x265   : > { %v1136_v11 = vpop.f32.mrf.mxu2  ;;  %v1149_v12 = vpop.f32.mrf.mxu3 }
 0x267   : > { %v1171_v13 = vpop.f32.mrf.mxu0 }
 0x268   : > { %v1184_v14 = vpop.f32.mrf.mxu1  ;;  %v1172_v37 = vadd.f32 %v1171_v13, %v1136_v11 }
 0x269   : > { %v1185_v38 = vadd.f32 %v1184_v14, %v1149_v12 }
 0x26d   : > { %v1138_v15 = vpop.f32.mrf.mxu2  ;;  %v1151_v16 = vpop.f32.mrf.mxu3 }
 0x26f   : > { %v1173_v17 = vpop.f32.mrf.mxu0 }
 0x270   : > { %v1186_v18 = vpop.f32.mrf.mxu1 }
 0x275   : > { %v1219_v19 = vpop.f32.mrf.mxu2  ;;  %v1232_v20 = vpop.f32.mrf.mxu3 }
 0x276   : > { %v1236_v39 = vadd.f32 %v1219_v19, %v1172_v37  ;;  %v1237_v40 = vadd.f32 %v1232_v20, %v1185_v38 }
 0x277   : > { %v1269_v21 = vpop.f32.mrf.mxu0 }
 0x278   : > { %v1282_v22 = vpop.f32.mrf.mxu1  ;;  %v1286_v52 = vadd.f32 %v1269_v21, %v1236_v39 }
 0x279   : > { %v1287_v45 = vadd.f32 %v1282_v22, %v1237_v40 }
 0x27d   : > { %v1221_v23 = vpop.f32.mrf.mxu2  ;;  %v1234_v24 = vpop.f32.mrf.mxu3 }
 0x27f   : > { %v1271_v25 = vpop.f32.mrf.mxu0 }
 0x280   : > { %v1284_v26 = vpop.f32.mrf.mxu1 }
 0x285   : > { %v1308_v27 = vpop.f32.mrf.mxu2  ;;  %v1321_v28 = vpop.f32.mrf.mxu3 }
 0x286   : > { %v1325_v46 = vadd.f32 %v1308_v27, %v1286_v52  ;;  %v1326_v47 = vadd.f32 %v1321_v28, %v1287_v45 }
 0x287   : > { %v1358_v30 = vpop.f32.mrf.mxu0 }
 0x288   : > { %v1371_v31 = vpop.f32.mrf.mxu1  ;;  %v1375_v53 = vadd.f32 %v1358_v30, %v1325_v46 }
 0x289   : > { %v1376_v54 = vadd.f32 %v1371_v31, %v1326_v47 }
 0x28d   : > { %v1310_v32 = vpop.f32.mrf.mxu2  ;;  %v1323_v33 = vpop.f32.mrf.mxu3 }
 0x28f   : > { %v1360_v35 = vpop.f32.mrf.mxu0 }
 0x290   : > { %v1373_v36 = vpop.f32.mrf.mxu1 }
 0x295   : > { %v1408_v41 = vpop.f32.mrf.mxu2  ;;  %v1421_v42 = vpop.f32.mrf.mxu3 }
 0x296   : > { %v1425_v57 = vadd.f32 %v1408_v41, %v1375_v53  ;;  %v1426_v58 = vadd.f32 %v1421_v42, %v1376_v54 }
 0x297   : > { %v1453_v43 = vpop.f32.mrf.mxu0 }
 0x298   : > { %v1466_v44 = vpop.f32.mrf.mxu1  ;;  %v1470_v59 = vadd.f32 %v1453_v43, %v1425_v57 }
 0x299   : > { %v1471_v60 = vadd.f32 %v1466_v44, %v1426_v58 }
 0x29d   : > { %v1410_v49 = vpop.f32.mrf.mxu2  ;;  %v1423_v51 = vpop.f32.mrf.mxu3 }
 0x29f   : > { %v1455_v56 = vpop.f32.mrf.mxu0 }
 0x2a0   : > { %v1468_v55 = vpop.f32.mrf.mxu1 }
 0x2a5   : > { %v1503_v34 = vpop.f32.mrf.mxu2  ;;  %v1516_v61 = vpop.f32.mrf.mxu3 }
 0x2a6   : > { %v1520_v62 = vadd.f32 %v1503_v34, %v1470_v59  ;;  %v1521_v63 = vadd.f32 %v1516_v61, %v1471_v60 }
 0x2a8   : > { %v1527_v2 = vmul.f32 %v1525_v1, %v1520_v62  ;;  %v1528_v3 = vmul.f32 %v1525_v1, %v1521_v63  ;;  %v1547_v4 = vrot.slane %v1521_v63, 4 }
 0x2aa   : > { %v1535_v6 = vadd.f32 %v1532_v5, %v1528_v3  ;;  %v1548_v29 = vsel %vm1076_vm6, %v1520_v62, %v1547_v4  ;;  %v1534_v48 = vadd.f32 %v1532_v5, %v1527_v2 }
 0x2ab   : > { %1550 = vst [vmem:[%s525_s16] sm:$0xff] %v1548_v29 }
 0x2ac   : > { %v1538_v7 = vrot.slane %v1535_v6, 4 }
 0x2ad   : > { %v1518_v8 = vpop.f32.mrf.mxu3  ;;  %v1505_v9 = vpop.f32.mrf.mxu2 }
 0x2ae   : > { %v1539_v10 = vsel %vm1076_vm6, %v1534_v48, %v1538_v7 }
 0x2af   : > { %v1541_v11 = vadd.f32 %v1539_v10, %v2021_v0  ;;  %1551 = vst [vmem:[%s530_s20] sm:$0xff] %v1539_v10 }
 0x2b1   : > { %vm1542_vm12 = vcmp.ge.f32.partialorder %v1541_v11, 1.0  ;;  %1552 = vst [vmem:[%s535_s17] sm:$0xff] %v1541_v11 }
 0x2b2   : > { %v1882_v12 = vsel %vm1542_vm12, 1.0, %v1931_v50 }
 0x2b3   : > { %1553 = vst [vmem:[%s540_s23] sm:$0xff] %v1882_v12 }
 0x2b4 PF: > { %s25_s29 = sadd.s32 1, %s1920_s29  }
 0x2b5   : > { %p22_p4 = scmp.ge.s32.totalorder %s25_s29, 4  }
 0x2b7   :  { %24 = sbr.rel (!%p22_p4) target bundleno = 1 (0x1), region = 170 }

</bundles_post_ra>
